<compile_context>
chip_gen: v7x
topology: tpu7x:2x2x1
jax: 0.10.0
libtpu: 0.0.40
codegen_flags: <defaults>
</compile_context>

<pallas_src>
import functools

import numpy as np
import jax
import jax.numpy as jnp
from jax.experimental import pallas as pl
from jax.experimental.pallas import tpu as pltpu

SEQ_LEN_MAX = 100     # pos_embed max length (as in the PyTorch module)
D_MODEL = 32
NHEAD = 4
DIM_FF = 2048         # nn.TransformerEncoderLayer default
LN_EPS = 1e-5
TARGET_ROWS = 512     # packed rows (Bt*S) per grid step


def _layernorm(z, gamma, beta):
    mu = jnp.mean(z, axis=-1, keepdims=True)
    var = jnp.mean((z - mu) ** 2, axis=-1, keepdims=True)
    return (z - mu) * jax.lax.rsqrt(var + LN_EPS) * gamma + beta


def encoder_layer_kernel(x_ref, pos_ref,
                         wq_ref, wk_ref, wv_ref, bq_ref, bk_ref, bv_ref,
                         wo_ref, bo_ref,
                         g1_ref, be1_ref, w1_ref, b1_ref, w2_ref, b2_ref,
                         g2_ref, be2_ref, o_ref, *, nhead):
    """One full transformer-encoder layer for a packed block of Bt batch elements."""
    Bt, S, D = x_ref.shape
    hd = D // nhead

    # learnable positional encoding (broadcast across the packed batch)
    x = x_ref[...].astype(jnp.float32) + pos_ref[...][None, :, :]        # (Bt, S, D)
    # flatten to M = Bt*S rows so every projection / FF matmul fills the MXU M dim
    xf = x.reshape(Bt * S, D)

    # ---- multi-head self-attention ---------------------------------------
    # Weights are pre-split per head on the host, so the kernel never lane-slices
    # activations and never concatenates head outputs:
    #   attn @ Wo == sum_h ctx_h @ Wo[h*hd:(h+1)*hd, :]
    attn_acc = jnp.zeros((Bt * S, D), jnp.float32)
    for h in range(nhead):                                   # static unroll (nhead = 4)
        qh = (jnp.dot(xf, wq_ref[h], preferred_element_type=jnp.float32)
              + bq_ref[h]).reshape(Bt, S, hd)                # 1/sqrt(hd) folded into wq/bq
        kh = (jnp.dot(xf, wk_ref[h], preferred_element_type=jnp.float32)
              + bk_ref[h]).reshape(Bt, S, hd)
        vh = (jnp.dot(xf, wv_ref[h], preferred_element_type=jnp.float32)
              + bv_ref[h]).reshape(Bt, S, hd)
        s = jnp.einsum("bqd,bkd->bqk", qh, kh,
                       preferred_element_type=jnp.float32)   # (Bt, S, S), batched over Bt
        s = s - jnp.max(s, axis=-1, keepdims=True)
        p = jnp.exp(s)
        p = p * pl.reciprocal(jnp.sum(p, axis=-1, keepdims=True), approx=True)   # EUP slot
        ctx = jnp.einsum("bqk,bkd->bqd", p, vh,
                         preferred_element_type=jnp.float32)                     # (Bt, S, hd)
        attn_acc = attn_acc + jnp.dot(ctx.reshape(Bt * S, hd), wo_ref[h],
                                      preferred_element_type=jnp.float32)
    attn_out = attn_acc + bo_ref[...]

    # residual + LayerNorm 1 (post-norm, PyTorch default)
    x1 = _layernorm(xf + attn_out, g1_ref[...], be1_ref[...])

    # feed-forward D -> DIM_FF -> D with ReLU, on packed M = Bt*S rows.
    # NOTE: kept f32 to match PyTorch eval numerics; casting x1/hmid/w1/w2 to bf16
    # (with f32 accumulation) would roughly double MXU throughput if tolerance permits.
    hmid = jnp.dot(x1, w1_ref[...], preferred_element_type=jnp.float32) + b1_ref[...]
    hmid = jnp.maximum(hmid, 0.0)
    ff = jnp.dot(hmid, w2_ref[...], preferred_element_type=jnp.float32) + b2_ref[...]

    # residual + LayerNorm 2
    out = _layernorm(x1 + ff, g2_ref[...], be2_ref[...])
    o_ref[...] = out.reshape(Bt, S, D).astype(o_ref.dtype)


def _zero_index(b, *, ndim):
    return (0,) * ndim


def _choose_block_batch(B, S):
    """Pick Bt so M = Bt*S approaches TARGET_ROWS (amortizes per-step overhead and MXU
    pipeline fill) while keeping >=2 grid steps when possible (v7x has 2 TensorCores)
    and Bt | B.  VMEM stays small: hmid is (Bt*S, 2048) f32 = 4 MiB at Bt*S = 512."""
    target = max(1, TARGET_ROWS // max(S, 1))
    bt = min(B, target)
    while bt > 1 and B % bt:
        bt -= 1
    if bt == B and B > 1:            # keep at least 2 grid steps for megacore
        bt = max(1, B // 2)
        while bt > 1 and B % bt:
            bt -= 1
    return max(bt, 1)


def _prepare_kernel_params(params, S):
    """Host-side prep: split fused QKV / output-proj weights per head, fold 1/sqrt(hd) into Q."""
    D, H = D_MODEL, NHEAD
    hd = D // H
    scale = 1.0 / np.sqrt(hd)

    wqkv = params["wqkv"]            # (D, 3D), stored as (in, out)
    bqkv = params["bqkv"][0]         # (3D,)
    wq, wk, wv = wqkv[:, :D], wqkv[:, D:2 * D], wqkv[:, 2 * D:]
    bq, bk, bv = bqkv[:D], bqkv[D:2 * D], bqkv[2 * D:]

    def split_w(w):                  # (D, D) -> (H, D, hd): head h = output cols h*hd:(h+1)*hd
        return w.reshape(D, H, hd).transpose(1, 0, 2)

    def split_b(b):                  # (D,) -> (H, 1, hd)
        return b.reshape(H, 1, hd)

    return {
        "pos": params["pos_embed"][0, :S, :],          # (S, D)
        "wq": split_w(wq) * scale, "bq": split_b(bq) * scale,
        "wk": split_w(wk),         "bk": split_b(bk),
        "wv": split_w(wv),         "bv": split_b(bv),
        "wo": params["wo"].reshape(H, hd, D),          # row block h*hd:(h+1)*hd -> head h
        "bo": params["bo"],
        "ln1_g": params["ln1_g"], "ln1_b": params["ln1_b"],
        "w1": params["w1"], "b1": params["b1"],
        "w2": params["w2"], "b2": params["b2"],
        "ln2_g": params["ln2_g"], "ln2_b": params["ln2_b"],
    }


def time_series_transformer(x, params, *, block_batch=None):
    """x: (B, S, D) float32. params: dict of weights (see init_params)."""
    B, S, D = x.shape
    assert D == D_MODEL and S <= SEQ_LEN_MAX

    bt = _choose_block_batch(B, S) if block_batch is None else block_batch
    assert B % bt == 0

    kp = _prepare_kernel_params(params, S)
    weight_args = (
        kp["pos"],
        kp["wq"], kp["wk"], kp["wv"], kp["bq"], kp["bk"], kp["bv"],
        kp["wo"], kp["bo"],
        kp["ln1_g"], kp["ln1_b"],
        kp["w1"], kp["b1"], kp["w2"], kp["b2"],
        kp["ln2_g"], kp["ln2_b"],
    )
    # full-array blocks for all weights (constant index maps -> fetched once, kept resident)
    weight_specs = [pl.BlockSpec(w.shape, functools.partial(_zero_index, ndim=w.ndim))
                    for w in weight_args]

    kernel = functools.partial(encoder_layer_kernel, nhead=NHEAD)

    return pl.pallas_call(
        kernel,
        out_shape=jax.ShapeDtypeStruct((B, S, D), x.dtype),
        grid=(B // bt,),
        in_specs=[pl.BlockSpec((bt, S, D), lambda b: (b, 0, 0))] + weight_specs,
        out_specs=pl.BlockSpec((bt, S, D), lambda b: (b, 0, 0)),
        compiler_params=pltpu.CompilerParams(
            dimension_semantics=("parallel",),
            vmem_limit_bytes=32 * 1024 * 1024,   # headroom over v5e's 16-MiB default scope
        ),
    )(x, *weight_args)


def init_params(key, d_model=D_MODEL, dim_ff=DIM_FF, seq_len_max=SEQ_LEN_MAX):
    ks = jax.random.split(key, 10)
    f32 = jnp.float32
    p = {}
    p["pos_embed"] = jax.random.normal(ks[0], (1, seq_len_max, d_model), f32)
    # weights stored as (in, out) so forward computes x @ W + b  (== x @ W_pt.T + b)
    p["wqkv"] = jax.random.normal(ks[1], (d_model, 3 * d_model), f32) * 0.05
    p["bqkv"] = jax.random.normal(ks[2], (1, 3 * d_model), f32) * 0.05
    p["wo"] = jax.random.normal(ks[3], (d_model, d_model), f32) * 0.05
    p["bo"] = jax.random.normal(ks[4], (1, d_model), f32) * 0.05
    p["w1"] = jax.random.normal(ks[5], (d_model, dim_ff), f32) * 0.05
    p["b1"] = jax.random.normal(ks[6], (1, dim_ff), f32) * 0.05
    p["w2"] = jax.random.normal(ks[7], (dim_ff, d_model), f32) * 0.05
    p["b2"] = jax.random.normal(ks[8], (1, d_model), f32) * 0.05
    p["ln1_g"] = jnp.ones((1, d_model), f32)
    p["ln1_b"] = jnp.zeros((1, d_model), f32)
    p["ln2_g"] = jnp.ones((1, d_model), f32)
    p["ln2_b"] = jnp.zeros((1, d_model), f32)
    return p


def reference_forward(x, params):
    """Pure-JAX reference mirroring PyTorch TransformerEncoderLayer (eval) semantics."""
    B, S, D = x.shape
    hd = D // NHEAD
    x = x + params["pos_embed"][:, :S, :]
    qkv = x @ params["wqkv"] + params["bqkv"][0]               # (B, S, 3D)
    q, k, v = qkv[..., :D], qkv[..., D:2 * D], qkv[..., 2 * D:]
    q = q.reshape(B, S, NHEAD, hd).transpose(0, 2, 1, 3)
    k = k.reshape(B, S, NHEAD, hd).transpose(0, 2, 1, 3)
    v = v.reshape(B, S, NHEAD, hd).transpose(0, 2, 1, 3)
    s = jnp.einsum("bhqd,bhkd->bhqk", q, k) / (hd ** 0.5)
    p = jax.nn.softmax(s, axis=-1)
    attn = jnp.einsum("bhqk,bhkd->bhqd", p, v).transpose(0, 2, 1, 3).reshape(B, S, D)
    attn = attn @ params["wo"] + params["bo"][0]

    def ln(z, g, b):
        mu = jnp.mean(z, axis=-1, keepdims=True)
        var = jnp.mean((z - mu) ** 2, axis=-1, keepdims=True)
        return (z - mu) * jax.lax.rsqrt(var + LN_EPS) * g + b

    x1 = ln(x + attn, params["ln1_g"][0], params["ln1_b"][0])
    ff = jnp.maximum(x1 @ params["w1"] + params["b1"][0], 0.0) @ params["w2"] + params["b2"][0]
    return ln(x1 + ff, params["ln2_g"][0], params["ln2_b"][0])


if __name__ == "__main__":
    key = jax.random.PRNGKey(0)
    k_x, k_p = jax.random.split(key)

    B, S = 2, 8
    x = jax.random.normal(k_x, (B, S, D_MODEL), jnp.float32)
    params = init_params(k_p)

    out = jax.block_until_ready(time_series_transformer(x, params))
    ref = jax.block_until_ready(reference_forward(x, params))

    # Tolerance reflects only the EUP approx-reciprocal in the softmax denominator;
    # all matmuls/accumulation remain f32.
    np.testing.assert_allclose(np.asarray(out), np.asarray(ref), rtol=2e-3, atol=2e-3)
    assert out.shape == (B, S, D_MODEL)
    print("KERNEL_OK")
</pallas_src>

<mosaic_0001>
module attributes {stable_mosaic.version = 11 : i64} {
  func.func @encoder_layer_kernel(%arg0: i32, %arg1: memref<1x8x32xf32, #tpu.memory_space<vmem>>, %arg2: memref<8x32xf32, #tpu.memory_space<vmem>>, %arg3: memref<4x32x8xf32, #tpu.memory_space<vmem>>, %arg4: memref<4x32x8xf32, #tpu.memory_space<vmem>>, %arg5: memref<4x32x8xf32, #tpu.memory_space<vmem>>, %arg6: memref<4x1x8xf32, #tpu.memory_space<vmem>>, %arg7: memref<4x1x8xf32, #tpu.memory_space<vmem>>, %arg8: memref<4x1x8xf32, #tpu.memory_space<vmem>>, %arg9: memref<4x8x32xf32, #tpu.memory_space<vmem>>, %arg10: memref<1x32xf32, #tpu.memory_space<vmem>>, %arg11: memref<1x32xf32, #tpu.memory_space<vmem>>, %arg12: memref<1x32xf32, #tpu.memory_space<vmem>>, %arg13: memref<32x2048xf32, #tpu.memory_space<vmem>>, %arg14: memref<1x2048xf32, #tpu.memory_space<vmem>>, %arg15: memref<2048x32xf32, #tpu.memory_space<vmem>>, %arg16: memref<1x32xf32, #tpu.memory_space<vmem>>, %arg17: memref<1x32xf32, #tpu.memory_space<vmem>>, %arg18: memref<1x32xf32, #tpu.memory_space<vmem>>, %arg19: memref<1x8x32xf32, #tpu.memory_space<vmem>>) attributes {dimension_semantics = [#tpu.dimension_semantics<parallel>], iteration_bounds = array<i64: 2>, scalar_prefetch = 0 : i64, scratch_operands = 0 : i64, tpu.core_type = #tpu.core_type<tc>, window_params = [{transform_indices = @transform_0, window_bounds = array<i64: 1, 8, 32>}, {pipeline_mode = #tpu.pipeline_mode<synchronous>, transform_indices = @transform_1, window_bounds = array<i64: 8, 32>}, {pipeline_mode = #tpu.pipeline_mode<synchronous>, transform_indices = @transform_2, window_bounds = array<i64: 4, 32, 8>}, {pipeline_mode = #tpu.pipeline_mode<synchronous>, transform_indices = @transform_3, window_bounds = array<i64: 4, 32, 8>}, {pipeline_mode = #tpu.pipeline_mode<synchronous>, transform_indices = @transform_4, window_bounds = array<i64: 4, 32, 8>}, {pipeline_mode = #tpu.pipeline_mode<synchronous>, transform_indices = @transform_5, window_bounds = array<i64: 4, 1, 8>}, {pipeline_mode = #tpu.pipeline_mode<synchronous>, transform_indices = @transform_6, window_bounds = array<i64: 4, 1, 8>}, {pipeline_mode = #tpu.pipeline_mode<synchronous>, transform_indices = @transform_7, window_bounds = array<i64: 4, 1, 8>}, {pipeline_mode = #tpu.pipeline_mode<synchronous>, transform_indices = @transform_8, window_bounds = array<i64: 4, 8, 32>}, {pipeline_mode = #tpu.pipeline_mode<synchronous>, transform_indices = @transform_9, window_bounds = array<i64: 1, 32>}, {pipeline_mode = #tpu.pipeline_mode<synchronous>, transform_indices = @transform_10, window_bounds = array<i64: 1, 32>}, {pipeline_mode = #tpu.pipeline_mode<synchronous>, transform_indices = @transform_11, window_bounds = array<i64: 1, 32>}, {pipeline_mode = #tpu.pipeline_mode<synchronous>, transform_indices = @transform_12, window_bounds = array<i64: 32, 2048>}, {pipeline_mode = #tpu.pipeline_mode<synchronous>, transform_indices = @transform_13, window_bounds = array<i64: 1, 2048>}, {pipeline_mode = #tpu.pipeline_mode<synchronous>, transform_indices = @transform_14, window_bounds = array<i64: 2048, 32>}, {pipeline_mode = #tpu.pipeline_mode<synchronous>, transform_indices = @transform_15, window_bounds = array<i64: 1, 32>}, {pipeline_mode = #tpu.pipeline_mode<synchronous>, transform_indices = @transform_16, window_bounds = array<i64: 1, 32>}, {pipeline_mode = #tpu.pipeline_mode<synchronous>, transform_indices = @transform_17, window_bounds = array<i64: 1, 32>}, {transform_indices = @transform_18, window_bounds = array<i64: 1, 8, 32>}]} {
    %c0 = arith.constant 0 : index
    %c0_0 = arith.constant 0 : index
    %c0_1 = arith.constant 0 : index
    %0 = vector.load %arg1[%c0, %c0_0, %c0_1] : memref<1x8x32xf32, #tpu.memory_space<vmem>>, vector<1x8x32xf32>
    %c0_2 = arith.constant 0 : index
    %c0_3 = arith.constant 0 : index
    %1 = vector.load %arg2[%c0_2, %c0_3] : memref<8x32xf32, #tpu.memory_space<vmem>>, vector<8x32xf32>
    %2 = vector.shape_cast %1 : vector<8x32xf32> to vector<1x8x32xf32>
    %3 = arith.addf %0, %2 : vector<1x8x32xf32>
    %4 = vector.shape_cast %3 : vector<1x8x32xf32> to vector<8x32xf32>
    %cst = arith.constant 0.000000e+00 : f32
    %5 = vector.broadcast %cst : f32 to vector<8x32xf32>
    %c0_4 = arith.constant 0 : index
    %c0_5 = arith.constant 0 : index
    %c0_6 = arith.constant 0 : index
    %6 = vector.load %arg3[%c0_4, %c0_5, %c0_6] : memref<4x32x8xf32, #tpu.memory_space<vmem>>, vector<1x32x8xf32>
    %7 = vector.shape_cast %6 : vector<1x32x8xf32> to vector<32x8xf32>
    %cst_7 = arith.constant dense<0.000000e+00> : vector<8x8xf32>
    %8 = tpu.matmul %4, %7, %cst_7 {dimension_numbers = #tpu.dot_dimension_numbers<[1], [0], [0], [1], [0, 0, 1, 1], [], []>} : vector<8x32xf32>, vector<32x8xf32>, vector<8x8xf32> -> vector<8x8xf32>
    %c0_8 = arith.constant 0 : index
    %c0_9 = arith.constant 0 : index
    %c0_10 = arith.constant 0 : index
    %9 = vector.load %arg6[%c0_8, %c0_9, %c0_10] : memref<4x1x8xf32, #tpu.memory_space<vmem>>, vector<1x1x8xf32>
    %10 = vector.shape_cast %9 : vector<1x1x8xf32> to vector<1x8xf32>
    %11 = vector.broadcast %10 : vector<1x8xf32> to vector<8x8xf32>
    %12 = arith.addf %8, %11 : vector<8x8xf32>
    %13 = vector.shape_cast %12 : vector<8x8xf32> to vector<1x8x8xf32>
    %c0_11 = arith.constant 0 : index
    %c0_12 = arith.constant 0 : index
    %c0_13 = arith.constant 0 : index
    %14 = vector.load %arg4[%c0_11, %c0_12, %c0_13] : memref<4x32x8xf32, #tpu.memory_space<vmem>>, vector<1x32x8xf32>
    %15 = vector.shape_cast %14 : vector<1x32x8xf32> to vector<32x8xf32>
    %cst_14 = arith.constant dense<0.000000e+00> : vector<8x8xf32>
    %16 = tpu.matmul %4, %15, %cst_14 {dimension_numbers = #tpu.dot_dimension_numbers<[1], [0], [0], [1], [0, 0, 1, 1], [], []>} : vector<8x32xf32>, vector<32x8xf32>, vector<8x8xf32> -> vector<8x8xf32>
    %c0_15 = arith.constant 0 : index
    %c0_16 = arith.constant 0 : index
    %c0_17 = arith.constant 0 : index
    %17 = vector.load %arg7[%c0_15, %c0_16, %c0_17] : memref<4x1x8xf32, #tpu.memory_space<vmem>>, vector<1x1x8xf32>
    %18 = vector.shape_cast %17 : vector<1x1x8xf32> to vector<1x8xf32>
    %19 = vector.broadcast %18 : vector<1x8xf32> to vector<8x8xf32>
    %20 = arith.addf %16, %19 : vector<8x8xf32>
    %21 = vector.shape_cast %20 : vector<8x8xf32> to vector<1x8x8xf32>
    %c0_18 = arith.constant 0 : index
    %c0_19 = arith.constant 0 : index
    %c0_20 = arith.constant 0 : index
    %22 = vector.load %arg5[%c0_18, %c0_19, %c0_20] : memref<4x32x8xf32, #tpu.memory_space<vmem>>, vector<1x32x8xf32>
    %23 = vector.shape_cast %22 : vector<1x32x8xf32> to vector<32x8xf32>
    %cst_21 = arith.constant dense<0.000000e+00> : vector<8x8xf32>
    %24 = tpu.matmul %4, %23, %cst_21 {dimension_numbers = #tpu.dot_dimension_numbers<[1], [0], [0], [1], [0, 0, 1, 1], [], []>} : vector<8x32xf32>, vector<32x8xf32>, vector<8x8xf32> -> vector<8x8xf32>
    %c0_22 = arith.constant 0 : index
    %c0_23 = arith.constant 0 : index
    %c0_24 = arith.constant 0 : index
    %25 = vector.load %arg8[%c0_22, %c0_23, %c0_24] : memref<4x1x8xf32, #tpu.memory_space<vmem>>, vector<1x1x8xf32>
    %26 = vector.shape_cast %25 : vector<1x1x8xf32> to vector<1x8xf32>
    %27 = vector.broadcast %26 : vector<1x8xf32> to vector<8x8xf32>
    %28 = arith.addf %24, %27 : vector<8x8xf32>
    %29 = vector.shape_cast %28 : vector<8x8xf32> to vector<1x8x8xf32>
    "tpu.trace_start"() <{level = 10 : i32, message = "bqd,bkd->bqk"}> : () -> ()
    %cst_25 = arith.constant dense<0.000000e+00> : vector<1x8x8xf32>
    %30 = tpu.matmul %13, %21, %cst_25 {dimension_numbers = #tpu.dot_dimension_numbers<[2], [2], [1], [1], [0, 0, 0, 1, 1, 1], [0], [0]>} : vector<1x8x8xf32>, vector<1x8x8xf32>, vector<1x8x8xf32> -> vector<1x8x8xf32>
    "tpu.trace_stop"() : () -> ()
    %cst_26 = arith.constant dense<0xFF800000> : vector<1x8xf32>
    %31 = vector.multi_reduction <maximumf>, %30, %cst_26 [2] : vector<1x8x8xf32> to vector<1x8xf32>
    %32 = vector.shape_cast %31 : vector<1x8xf32> to vector<1x8x1xf32>
    %33 = vector.broadcast %32 : vector<1x8x1xf32> to vector<1x8x8xf32>
    %34 = arith.subf %30, %33 : vector<1x8x8xf32>
    %35 = math.exp %34 : vector<1x8x8xf32>
    %cst_27 = arith.constant dense<0.000000e+00> : vector<1x8xf32>
    %36 = vector.multi_reduction <add>, %35, %cst_27 [2] : vector<1x8x8xf32> to vector<1x8xf32>
    %37 = vector.shape_cast %36 : vector<1x8xf32> to vector<1x8x1xf32>
    %38 = tpu.reciprocal %37 {approx = true} : vector<1x8x1xf32> -> vector<1x8x1xf32>
    %39 = vector.broadcast %38 : vector<1x8x1xf32> to vector<1x8x8xf32>
    %40 = arith.mulf %35, %39 : vector<1x8x8xf32>
    "tpu.trace_start"() <{level = 10 : i32, message = "bqk,bkd->bqd"}> : () -> ()
    %cst_28 = arith.constant dense<0.000000e+00> : vector<1x8x8xf32>
    %41 = tpu.matmul %40, %29, %cst_28 {dimension_numbers = #tpu.dot_dimension_numbers<[2], [1], [1], [2], [0, 0, 0, 1, 1, 2], [0], [0]>} : vector<1x8x8xf32>, vector<1x8x8xf32>, vector<1x8x8xf32> -> vector<1x8x8xf32>
    "tpu.trace_stop"() : () -> ()
    %42 = vector.shape_cast %41 : vector<1x8x8xf32> to vector<8x8xf32>
    %c0_29 = arith.constant 0 : index
    %c0_30 = arith.constant 0 : index
    %c0_31 = arith.constant 0 : index
    %43 = vector.load %arg9[%c0_29, %c0_30, %c0_31] : memref<4x8x32xf32, #tpu.memory_space<vmem>>, vector<1x8x32xf32>
    %44 = vector.shape_cast %43 : vector<1x8x32xf32> to vector<8x32xf32>
    %cst_32 = arith.constant dense<0.000000e+00> : vector<8x32xf32>
    %45 = tpu.matmul %42, %44, %cst_32 {dimension_numbers = #tpu.dot_dimension_numbers<[1], [0], [0], [1], [0, 0, 1, 1], [], []>} : vector<8x8xf32>, vector<8x32xf32>, vector<8x32xf32> -> vector<8x32xf32>
    %46 = arith.addf %5, %45 : vector<8x32xf32>
    %c1 = arith.constant 1 : index
    %c0_33 = arith.constant 0 : index
    %c0_34 = arith.constant 0 : index
    %47 = vector.load %arg3[%c1, %c0_33, %c0_34] : memref<4x32x8xf32, #tpu.memory_space<vmem>>, vector<1x32x8xf32>
    %48 = vector.shape_cast %47 : vector<1x32x8xf32> to vector<32x8xf32>
    %cst_35 = arith.constant dense<0.000000e+00> : vector<8x8xf32>
    %49 = tpu.matmul %4, %48, %cst_35 {dimension_numbers = #tpu.dot_dimension_numbers<[1], [0], [0], [1], [0, 0, 1, 1], [], []>} : vector<8x32xf32>, vector<32x8xf32>, vector<8x8xf32> -> vector<8x8xf32>
    %c1_36 = arith.constant 1 : index
    %c0_37 = arith.constant 0 : index
    %c0_38 = arith.constant 0 : index
    %50 = vector.load %arg6[%c1_36, %c0_37, %c0_38] : memref<4x1x8xf32, #tpu.memory_space<vmem>>, vector<1x1x8xf32>
    %51 = vector.shape_cast %50 : vector<1x1x8xf32> to vector<1x8xf32>
    %52 = vector.broadcast %51 : vector<1x8xf32> to vector<8x8xf32>
    %53 = arith.addf %49, %52 : vector<8x8xf32>
    %54 = vector.shape_cast %53 : vector<8x8xf32> to vector<1x8x8xf32>
    %c1_39 = arith.constant 1 : index
    %c0_40 = arith.constant 0 : index
    %c0_41 = arith.constant 0 : index
    %55 = vector.load %arg4[%c1_39, %c0_40, %c0_41] : memref<4x32x8xf32, #tpu.memory_space<vmem>>, vector<1x32x8xf32>
    %56 = vector.shape_cast %55 : vector<1x32x8xf32> to vector<32x8xf32>
    %cst_42 = arith.constant dense<0.000000e+00> : vector<8x8xf32>
    %57 = tpu.matmul %4, %56, %cst_42 {dimension_numbers = #tpu.dot_dimension_numbers<[1], [0], [0], [1], [0, 0, 1, 1], [], []>} : vector<8x32xf32>, vector<32x8xf32>, vector<8x8xf32> -> vector<8x8xf32>
    %c1_43 = arith.constant 1 : index
    %c0_44 = arith.constant 0 : index
    %c0_45 = arith.constant 0 : index
    %58 = vector.load %arg7[%c1_43, %c0_44, %c0_45] : memref<4x1x8xf32, #tpu.memory_space<vmem>>, vector<1x1x8xf32>
    %59 = vector.shape_cast %58 : vector<1x1x8xf32> to vector<1x8xf32>
    %60 = vector.broadcast %59 : vector<1x8xf32> to vector<8x8xf32>
    %61 = arith.addf %57, %60 : vector<8x8xf32>
    %62 = vector.shape_cast %61 : vector<8x8xf32> to vector<1x8x8xf32>
    %c1_46 = arith.constant 1 : index
    %c0_47 = arith.constant 0 : index
    %c0_48 = arith.constant 0 : index
    %63 = vector.load %arg5[%c1_46, %c0_47, %c0_48] : memref<4x32x8xf32, #tpu.memory_space<vmem>>, vector<1x32x8xf32>
    %64 = vector.shape_cast %63 : vector<1x32x8xf32> to vector<32x8xf32>
    %cst_49 = arith.constant dense<0.000000e+00> : vector<8x8xf32>
    %65 = tpu.matmul %4, %64, %cst_49 {dimension_numbers = #tpu.dot_dimension_numbers<[1], [0], [0], [1], [0, 0, 1, 1], [], []>} : vector<8x32xf32>, vector<32x8xf32>, vector<8x8xf32> -> vector<8x8xf32>
    %c1_50 = arith.constant 1 : index
    %c0_51 = arith.constant 0 : index
    %c0_52 = arith.constant 0 : index
    %66 = vector.load %arg8[%c1_50, %c0_51, %c0_52] : memref<4x1x8xf32, #tpu.memory_space<vmem>>, vector<1x1x8xf32>
    %67 = vector.shape_cast %66 : vector<1x1x8xf32> to vector<1x8xf32>
    %68 = vector.broadcast %67 : vector<1x8xf32> to vector<8x8xf32>
    %69 = arith.addf %65, %68 : vector<8x8xf32>
    %70 = vector.shape_cast %69 : vector<8x8xf32> to vector<1x8x8xf32>
    "tpu.trace_start"() <{level = 10 : i32, message = "bqd,bkd->bqk"}> : () -> ()
    %cst_53 = arith.constant dense<0.000000e+00> : vector<1x8x8xf32>
    %71 = tpu.matmul %54, %62, %cst_53 {dimension_numbers = #tpu.dot_dimension_numbers<[2], [2], [1], [1], [0, 0, 0, 1, 1, 1], [0], [0]>} : vector<1x8x8xf32>, vector<1x8x8xf32>, vector<1x8x8xf32> -> vector<1x8x8xf32>
    "tpu.trace_stop"() : () -> ()
    %cst_54 = arith.constant dense<0xFF800000> : vector<1x8xf32>
    %72 = vector.multi_reduction <maximumf>, %71, %cst_54 [2] : vector<1x8x8xf32> to vector<1x8xf32>
    %73 = vector.shape_cast %72 : vector<1x8xf32> to vector<1x8x1xf32>
    %74 = vector.broadcast %73 : vector<1x8x1xf32> to vector<1x8x8xf32>
    %75 = arith.subf %71, %74 : vector<1x8x8xf32>
    %76 = math.exp %75 : vector<1x8x8xf32>
    %cst_55 = arith.constant dense<0.000000e+00> : vector<1x8xf32>
    %77 = vector.multi_reduction <add>, %76, %cst_55 [2] : vector<1x8x8xf32> to vector<1x8xf32>
    %78 = vector.shape_cast %77 : vector<1x8xf32> to vector<1x8x1xf32>
    %79 = tpu.reciprocal %78 {approx = true} : vector<1x8x1xf32> -> vector<1x8x1xf32>
    %80 = vector.broadcast %79 : vector<1x8x1xf32> to vector<1x8x8xf32>
    %81 = arith.mulf %76, %80 : vector<1x8x8xf32>
    "tpu.trace_start"() <{level = 10 : i32, message = "bqk,bkd->bqd"}> : () -> ()
    %cst_56 = arith.constant dense<0.000000e+00> : vector<1x8x8xf32>
    %82 = tpu.matmul %81, %70, %cst_56 {dimension_numbers = #tpu.dot_dimension_numbers<[2], [1], [1], [2], [0, 0, 0, 1, 1, 2], [0], [0]>} : vector<1x8x8xf32>, vector<1x8x8xf32>, vector<1x8x8xf32> -> vector<1x8x8xf32>
    "tpu.trace_stop"() : () -> ()
    %83 = vector.shape_cast %82 : vector<1x8x8xf32> to vector<8x8xf32>
    %c1_57 = arith.constant 1 : index
    %c0_58 = arith.constant 0 : index
    %c0_59 = arith.constant 0 : index
    %84 = vector.load %arg9[%c1_57, %c0_58, %c0_59] : memref<4x8x32xf32, #tpu.memory_space<vmem>>, vector<1x8x32xf32>
    %85 = vector.shape_cast %84 : vector<1x8x32xf32> to vector<8x32xf32>
    %cst_60 = arith.constant dense<0.000000e+00> : vector<8x32xf32>
    %86 = tpu.matmul %83, %85, %cst_60 {dimension_numbers = #tpu.dot_dimension_numbers<[1], [0], [0], [1], [0, 0, 1, 1], [], []>} : vector<8x8xf32>, vector<8x32xf32>, vector<8x32xf32> -> vector<8x32xf32>
    %87 = arith.addf %46, %86 : vector<8x32xf32>
    %c2 = arith.constant 2 : index
    %c0_61 = arith.constant 0 : index
    %c0_62 = arith.constant 0 : index
    %88 = vector.load %arg3[%c2, %c0_61, %c0_62] : memref<4x32x8xf32, #tpu.memory_space<vmem>>, vector<1x32x8xf32>
    %89 = vector.shape_cast %88 : vector<1x32x8xf32> to vector<32x8xf32>
    %cst_63 = arith.constant dense<0.000000e+00> : vector<8x8xf32>
    %90 = tpu.matmul %4, %89, %cst_63 {dimension_numbers = #tpu.dot_dimension_numbers<[1], [0], [0], [1], [0, 0, 1, 1], [], []>} : vector<8x32xf32>, vector<32x8xf32>, vector<8x8xf32> -> vector<8x8xf32>
    %c2_64 = arith.constant 2 : index
    %c0_65 = arith.constant 0 : index
    %c0_66 = arith.constant 0 : index
    %91 = vector.load %arg6[%c2_64, %c0_65, %c0_66] : memref<4x1x8xf32, #tpu.memory_space<vmem>>, vector<1x1x8xf32>
    %92 = vector.shape_cast %91 : vector<1x1x8xf32> to vector<1x8xf32>
    %93 = vector.broadcast %92 : vector<1x8xf32> to vector<8x8xf32>
    %94 = arith.addf %90, %93 : vector<8x8xf32>
    %95 = vector.shape_cast %94 : vector<8x8xf32> to vector<1x8x8xf32>
    %c2_67 = arith.constant 2 : index
    %c0_68 = arith.constant 0 : index
    %c0_69 = arith.constant 0 : index
    %96 = vector.load %arg4[%c2_67, %c0_68, %c0_69] : memref<4x32x8xf32, #tpu.memory_space<vmem>>, vector<1x32x8xf32>
    %97 = vector.shape_cast %96 : vector<1x32x8xf32> to vector<32x8xf32>
    %cst_70 = arith.constant dense<0.000000e+00> : vector<8x8xf32>
    %98 = tpu.matmul %4, %97, %cst_70 {dimension_numbers = #tpu.dot_dimension_numbers<[1], [0], [0], [1], [0, 0, 1, 1], [], []>} : vector<8x32xf32>, vector<32x8xf32>, vector<8x8xf32> -> vector<8x8xf32>
    %c2_71 = arith.constant 2 : index
    %c0_72 = arith.constant 0 : index
    %c0_73 = arith.constant 0 : index
    %99 = vector.load %arg7[%c2_71, %c0_72, %c0_73] : memref<4x1x8xf32, #tpu.memory_space<vmem>>, vector<1x1x8xf32>
    %100 = vector.shape_cast %99 : vector<1x1x8xf32> to vector<1x8xf32>
    %101 = vector.broadcast %100 : vector<1x8xf32> to vector<8x8xf32>
    %102 = arith.addf %98, %101 : vector<8x8xf32>
    %103 = vector.shape_cast %102 : vector<8x8xf32> to vector<1x8x8xf32>
    %c2_74 = arith.constant 2 : index
    %c0_75 = arith.constant 0 : index
    %c0_76 = arith.constant 0 : index
    %104 = vector.load %arg5[%c2_74, %c0_75, %c0_76] : memref<4x32x8xf32, #tpu.memory_space<vmem>>, vector<1x32x8xf32>
    %105 = vector.shape_cast %104 : vector<1x32x8xf32> to vector<32x8xf32>
    %cst_77 = arith.constant dense<0.000000e+00> : vector<8x8xf32>
    %106 = tpu.matmul %4, %105, %cst_77 {dimension_numbers = #tpu.dot_dimension_numbers<[1], [0], [0], [1], [0, 0, 1, 1], [], []>} : vector<8x32xf32>, vector<32x8xf32>, vector<8x8xf32> -> vector<8x8xf32>
    %c2_78 = arith.constant 2 : index
    %c0_79 = arith.constant 0 : index
    %c0_80 = arith.constant 0 : index
    %107 = vector.load %arg8[%c2_78, %c0_79, %c0_80] : memref<4x1x8xf32, #tpu.memory_space<vmem>>, vector<1x1x8xf32>
    %108 = vector.shape_cast %107 : vector<1x1x8xf32> to vector<1x8xf32>
    %109 = vector.broadcast %108 : vector<1x8xf32> to vector<8x8xf32>
    %110 = arith.addf %106, %109 : vector<8x8xf32>
    %111 = vector.shape_cast %110 : vector<8x8xf32> to vector<1x8x8xf32>
    "tpu.trace_start"() <{level = 10 : i32, message = "bqd,bkd->bqk"}> : () -> ()
    %cst_81 = arith.constant dense<0.000000e+00> : vector<1x8x8xf32>
    %112 = tpu.matmul %95, %103, %cst_81 {dimension_numbers = #tpu.dot_dimension_numbers<[2], [2], [1], [1], [0, 0, 0, 1, 1, 1], [0], [0]>} : vector<1x8x8xf32>, vector<1x8x8xf32>, vector<1x8x8xf32> -> vector<1x8x8xf32>
    "tpu.trace_stop"() : () -> ()
    %cst_82 = arith.constant dense<0xFF800000> : vector<1x8xf32>
    %113 = vector.multi_reduction <maximumf>, %112, %cst_82 [2] : vector<1x8x8xf32> to vector<1x8xf32>
    %114 = vector.shape_cast %113 : vector<1x8xf32> to vector<1x8x1xf32>
    %115 = vector.broadcast %114 : vector<1x8x1xf32> to vector<1x8x8xf32>
    %116 = arith.subf %112, %115 : vector<1x8x8xf32>
    %117 = math.exp %116 : vector<1x8x8xf32>
    %cst_83 = arith.constant dense<0.000000e+00> : vector<1x8xf32>
    %118 = vector.multi_reduction <add>, %117, %cst_83 [2] : vector<1x8x8xf32> to vector<1x8xf32>
    %119 = vector.shape_cast %118 : vector<1x8xf32> to vector<1x8x1xf32>
    %120 = tpu.reciprocal %119 {approx = true} : vector<1x8x1xf32> -> vector<1x8x1xf32>
    %121 = vector.broadcast %120 : vector<1x8x1xf32> to vector<1x8x8xf32>
    %122 = arith.mulf %117, %121 : vector<1x8x8xf32>
    "tpu.trace_start"() <{level = 10 : i32, message = "bqk,bkd->bqd"}> : () -> ()
    %cst_84 = arith.constant dense<0.000000e+00> : vector<1x8x8xf32>
    %123 = tpu.matmul %122, %111, %cst_84 {dimension_numbers = #tpu.dot_dimension_numbers<[2], [1], [1], [2], [0, 0, 0, 1, 1, 2], [0], [0]>} : vector<1x8x8xf32>, vector<1x8x8xf32>, vector<1x8x8xf32> -> vector<1x8x8xf32>
    "tpu.trace_stop"() : () -> ()
    %124 = vector.shape_cast %123 : vector<1x8x8xf32> to vector<8x8xf32>
    %c2_85 = arith.constant 2 : index
    %c0_86 = arith.constant 0 : index
    %c0_87 = arith.constant 0 : index
    %125 = vector.load %arg9[%c2_85, %c0_86, %c0_87] : memref<4x8x32xf32, #tpu.memory_space<vmem>>, vector<1x8x32xf32>
    %126 = vector.shape_cast %125 : vector<1x8x32xf32> to vector<8x32xf32>
    %cst_88 = arith.constant dense<0.000000e+00> : vector<8x32xf32>
    %127 = tpu.matmul %124, %126, %cst_88 {dimension_numbers = #tpu.dot_dimension_numbers<[1], [0], [0], [1], [0, 0, 1, 1], [], []>} : vector<8x8xf32>, vector<8x32xf32>, vector<8x32xf32> -> vector<8x32xf32>
    %128 = arith.addf %87, %127 : vector<8x32xf32>
    %c3 = arith.constant 3 : index
    %c0_89 = arith.constant 0 : index
    %c0_90 = arith.constant 0 : index
    %129 = vector.load %arg3[%c3, %c0_89, %c0_90] : memref<4x32x8xf32, #tpu.memory_space<vmem>>, vector<1x32x8xf32>
    %130 = vector.shape_cast %129 : vector<1x32x8xf32> to vector<32x8xf32>
    %cst_91 = arith.constant dense<0.000000e+00> : vector<8x8xf32>
    %131 = tpu.matmul %4, %130, %cst_91 {dimension_numbers = #tpu.dot_dimension_numbers<[1], [0], [0], [1], [0, 0, 1, 1], [], []>} : vector<8x32xf32>, vector<32x8xf32>, vector<8x8xf32> -> vector<8x8xf32>
    %c3_92 = arith.constant 3 : index
    %c0_93 = arith.constant 0 : index
    %c0_94 = arith.constant 0 : index
    %132 = vector.load %arg6[%c3_92, %c0_93, %c0_94] : memref<4x1x8xf32, #tpu.memory_space<vmem>>, vector<1x1x8xf32>
    %133 = vector.shape_cast %132 : vector<1x1x8xf32> to vector<1x8xf32>
    %134 = vector.broadcast %133 : vector<1x8xf32> to vector<8x8xf32>
    %135 = arith.addf %131, %134 : vector<8x8xf32>
    %136 = vector.shape_cast %135 : vector<8x8xf32> to vector<1x8x8xf32>
    %c3_95 = arith.constant 3 : index
    %c0_96 = arith.constant 0 : index
    %c0_97 = arith.constant 0 : index
    %137 = vector.load %arg4[%c3_95, %c0_96, %c0_97] : memref<4x32x8xf32, #tpu.memory_space<vmem>>, vector<1x32x8xf32>
    %138 = vector.shape_cast %137 : vector<1x32x8xf32> to vector<32x8xf32>
    %cst_98 = arith.constant dense<0.000000e+00> : vector<8x8xf32>
    %139 = tpu.matmul %4, %138, %cst_98 {dimension_numbers = #tpu.dot_dimension_numbers<[1], [0], [0], [1], [0, 0, 1, 1], [], []>} : vector<8x32xf32>, vector<32x8xf32>, vector<8x8xf32> -> vector<8x8xf32>
    %c3_99 = arith.constant 3 : index
    %c0_100 = arith.constant 0 : index
    %c0_101 = arith.constant 0 : index
    %140 = vector.load %arg7[%c3_99, %c0_100, %c0_101] : memref<4x1x8xf32, #tpu.memory_space<vmem>>, vector<1x1x8xf32>
    %141 = vector.shape_cast %140 : vector<1x1x8xf32> to vector<1x8xf32>
    %142 = vector.broadcast %141 : vector<1x8xf32> to vector<8x8xf32>
    %143 = arith.addf %139, %142 : vector<8x8xf32>
    %144 = vector.shape_cast %143 : vector<8x8xf32> to vector<1x8x8xf32>
    %c3_102 = arith.constant 3 : index
    %c0_103 = arith.constant 0 : index
    %c0_104 = arith.constant 0 : index
    %145 = vector.load %arg5[%c3_102, %c0_103, %c0_104] : memref<4x32x8xf32, #tpu.memory_space<vmem>>, vector<1x32x8xf32>
    %146 = vector.shape_cast %145 : vector<1x32x8xf32> to vector<32x8xf32>
    %cst_105 = arith.constant dense<0.000000e+00> : vector<8x8xf32>
    %147 = tpu.matmul %4, %146, %cst_105 {dimension_numbers = #tpu.dot_dimension_numbers<[1], [0], [0], [1], [0, 0, 1, 1], [], []>} : vector<8x32xf32>, vector<32x8xf32>, vector<8x8xf32> -> vector<8x8xf32>
    %c3_106 = arith.constant 3 : index
    %c0_107 = arith.constant 0 : index
    %c0_108 = arith.constant 0 : index
    %148 = vector.load %arg8[%c3_106, %c0_107, %c0_108] : memref<4x1x8xf32, #tpu.memory_space<vmem>>, vector<1x1x8xf32>
    %149 = vector.shape_cast %148 : vector<1x1x8xf32> to vector<1x8xf32>
    %150 = vector.broadcast %149 : vector<1x8xf32> to vector<8x8xf32>
    %151 = arith.addf %147, %150 : vector<8x8xf32>
    %152 = vector.shape_cast %151 : vector<8x8xf32> to vector<1x8x8xf32>
    "tpu.trace_start"() <{level = 10 : i32, message = "bqd,bkd->bqk"}> : () -> ()
    %cst_109 = arith.constant dense<0.000000e+00> : vector<1x8x8xf32>
    %153 = tpu.matmul %136, %144, %cst_109 {dimension_numbers = #tpu.dot_dimension_numbers<[2], [2], [1], [1], [0, 0, 0, 1, 1, 1], [0], [0]>} : vector<1x8x8xf32>, vector<1x8x8xf32>, vector<1x8x8xf32> -> vector<1x8x8xf32>
    "tpu.trace_stop"() : () -> ()
    %cst_110 = arith.constant dense<0xFF800000> : vector<1x8xf32>
    %154 = vector.multi_reduction <maximumf>, %153, %cst_110 [2] : vector<1x8x8xf32> to vector<1x8xf32>
    %155 = vector.shape_cast %154 : vector<1x8xf32> to vector<1x8x1xf32>
    %156 = vector.broadcast %155 : vector<1x8x1xf32> to vector<1x8x8xf32>
    %157 = arith.subf %153, %156 : vector<1x8x8xf32>
    %158 = math.exp %157 : vector<1x8x8xf32>
    %cst_111 = arith.constant dense<0.000000e+00> : vector<1x8xf32>
    %159 = vector.multi_reduction <add>, %158, %cst_111 [2] : vector<1x8x8xf32> to vector<1x8xf32>
    %160 = vector.shape_cast %159 : vector<1x8xf32> to vector<1x8x1xf32>
    %161 = tpu.reciprocal %160 {approx = true} : vector<1x8x1xf32> -> vector<1x8x1xf32>
    %162 = vector.broadcast %161 : vector<1x8x1xf32> to vector<1x8x8xf32>
    %163 = arith.mulf %158, %162 : vector<1x8x8xf32>
    "tpu.trace_start"() <{level = 10 : i32, message = "bqk,bkd->bqd"}> : () -> ()
    %cst_112 = arith.constant dense<0.000000e+00> : vector<1x8x8xf32>
    %164 = tpu.matmul %163, %152, %cst_112 {dimension_numbers = #tpu.dot_dimension_numbers<[2], [1], [1], [2], [0, 0, 0, 1, 1, 2], [0], [0]>} : vector<1x8x8xf32>, vector<1x8x8xf32>, vector<1x8x8xf32> -> vector<1x8x8xf32>
    "tpu.trace_stop"() : () -> ()
    %165 = vector.shape_cast %164 : vector<1x8x8xf32> to vector<8x8xf32>
    %c3_113 = arith.constant 3 : index
    %c0_114 = arith.constant 0 : index
    %c0_115 = arith.constant 0 : index
    %166 = vector.load %arg9[%c3_113, %c0_114, %c0_115] : memref<4x8x32xf32, #tpu.memory_space<vmem>>, vector<1x8x32xf32>
    %167 = vector.shape_cast %166 : vector<1x8x32xf32> to vector<8x32xf32>
    %cst_116 = arith.constant dense<0.000000e+00> : vector<8x32xf32>
    %168 = tpu.matmul %165, %167, %cst_116 {dimension_numbers = #tpu.dot_dimension_numbers<[1], [0], [0], [1], [0, 0, 1, 1], [], []>} : vector<8x8xf32>, vector<8x32xf32>, vector<8x32xf32> -> vector<8x32xf32>
    %169 = arith.addf %128, %168 : vector<8x32xf32>
    %c0_117 = arith.constant 0 : index
    %c0_118 = arith.constant 0 : index
    %170 = vector.load %arg10[%c0_117, %c0_118] : memref<1x32xf32, #tpu.memory_space<vmem>>, vector<1x32xf32>
    %171 = vector.broadcast %170 : vector<1x32xf32> to vector<8x32xf32>
    %172 = arith.addf %169, %171 : vector<8x32xf32>
    %173 = arith.addf %4, %172 : vector<8x32xf32>
    %c0_119 = arith.constant 0 : index
    %c0_120 = arith.constant 0 : index
    %174 = vector.load %arg11[%c0_119, %c0_120] : memref<1x32xf32, #tpu.memory_space<vmem>>, vector<1x32xf32>
    %c0_121 = arith.constant 0 : index
    %c0_122 = arith.constant 0 : index
    %175 = vector.load %arg12[%c0_121, %c0_122] : memref<1x32xf32, #tpu.memory_space<vmem>>, vector<1x32xf32>
    %cst_123 = arith.constant dense<0.000000e+00> : vector<8xf32>
    %176 = vector.multi_reduction <add>, %173, %cst_123 [1] : vector<8x32xf32> to vector<8xf32>
    %177 = vector.shape_cast %176 : vector<8xf32> to vector<8x1xf32>
    %cst_124 = arith.constant 3.200000e+01 : f32
    %178 = vector.broadcast %cst_124 : f32 to vector<8x1xf32>
    %179 = arith.divf %177, %178 : vector<8x1xf32>
    %180 = vector.broadcast %179 : vector<8x1xf32> to vector<8x32xf32>
    %181 = arith.subf %173, %180 : vector<8x32xf32>
    %182 = arith.mulf %181, %181 : vector<8x32xf32>
    %cst_125 = arith.constant dense<0.000000e+00> : vector<8xf32>
    %183 = vector.multi_reduction <add>, %182, %cst_125 [1] : vector<8x32xf32> to vector<8xf32>
    %184 = vector.shape_cast %183 : vector<8xf32> to vector<8x1xf32>
    %cst_126 = arith.constant 3.200000e+01 : f32
    %185 = vector.broadcast %cst_126 : f32 to vector<8x1xf32>
    %186 = arith.divf %184, %185 : vector<8x1xf32>
    %187 = vector.broadcast %179 : vector<8x1xf32> to vector<8x32xf32>
    %188 = arith.subf %173, %187 : vector<8x32xf32>
    %cst_127 = arith.constant 9.99999974E-6 : f32
    %189 = vector.broadcast %cst_127 : f32 to vector<8x1xf32>
    %190 = arith.addf %186, %189 : vector<8x1xf32>
    %191 = math.rsqrt %190 : vector<8x1xf32>
    %192 = vector.broadcast %191 : vector<8x1xf32> to vector<8x32xf32>
    %193 = arith.mulf %188, %192 : vector<8x32xf32>
    %194 = vector.broadcast %174 : vector<1x32xf32> to vector<8x32xf32>
    %195 = arith.mulf %193, %194 : vector<8x32xf32>
    %196 = vector.broadcast %175 : vector<1x32xf32> to vector<8x32xf32>
    %197 = arith.addf %195, %196 : vector<8x32xf32>
    %c0_128 = arith.constant 0 : index
    %c0_129 = arith.constant 0 : index
    %198 = vector.load %arg13[%c0_128, %c0_129] : memref<32x2048xf32, #tpu.memory_space<vmem>>, vector<32x2048xf32>
    %cst_130 = arith.constant dense<0.000000e+00> : vector<8x2048xf32>
    %199 = tpu.matmul %197, %198, %cst_130 {dimension_numbers = #tpu.dot_dimension_numbers<[1], [0], [0], [1], [0, 0, 1, 1], [], []>} : vector<8x32xf32>, vector<32x2048xf32>, vector<8x2048xf32> -> vector<8x2048xf32>
    %c0_131 = arith.constant 0 : index
    %c0_132 = arith.constant 0 : index
    %200 = vector.load %arg14[%c0_131, %c0_132] : memref<1x2048xf32, #tpu.memory_space<vmem>>, vector<1x2048xf32>
    %201 = vector.broadcast %200 : vector<1x2048xf32> to vector<8x2048xf32>
    %202 = arith.addf %199, %201 : vector<8x2048xf32>
    %cst_133 = arith.constant 0.000000e+00 : f32
    %203 = vector.broadcast %cst_133 : f32 to vector<8x2048xf32>
    %204 = arith.maximumf %202, %203 : vector<8x2048xf32>
    %c0_134 = arith.constant 0 : index
    %c0_135 = arith.constant 0 : index
    %205 = vector.load %arg15[%c0_134, %c0_135] : memref<2048x32xf32, #tpu.memory_space<vmem>>, vector<2048x32xf32>
    %cst_136 = arith.constant dense<0.000000e+00> : vector<8x32xf32>
    %206 = tpu.matmul %204, %205, %cst_136 {dimension_numbers = #tpu.dot_dimension_numbers<[1], [0], [0], [1], [0, 0, 1, 1], [], []>} : vector<8x2048xf32>, vector<2048x32xf32>, vector<8x32xf32> -> vector<8x32xf32>
    %c0_137 = arith.constant 0 : index
    %c0_138 = arith.constant 0 : index
    %207 = vector.load %arg16[%c0_137, %c0_138] : memref<1x32xf32, #tpu.memory_space<vmem>>, vector<1x32xf32>
    %208 = vector.broadcast %207 : vector<1x32xf32> to vector<8x32xf32>
    %209 = arith.addf %206, %208 : vector<8x32xf32>
    %210 = arith.addf %197, %209 : vector<8x32xf32>
    %c0_139 = arith.constant 0 : index
    %c0_140 = arith.constant 0 : index
    %211 = vector.load %arg17[%c0_139, %c0_140] : memref<1x32xf32, #tpu.memory_space<vmem>>, vector<1x32xf32>
    %c0_141 = arith.constant 0 : index
    %c0_142 = arith.constant 0 : index
    %212 = vector.load %arg18[%c0_141, %c0_142] : memref<1x32xf32, #tpu.memory_space<vmem>>, vector<1x32xf32>
    %cst_143 = arith.constant dense<0.000000e+00> : vector<8xf32>
    %213 = vector.multi_reduction <add>, %210, %cst_143 [1] : vector<8x32xf32> to vector<8xf32>
    %214 = vector.shape_cast %213 : vector<8xf32> to vector<8x1xf32>
    %cst_144 = arith.constant 3.200000e+01 : f32
    %215 = vector.broadcast %cst_144 : f32 to vector<8x1xf32>
    %216 = arith.divf %214, %215 : vector<8x1xf32>
    %217 = vector.broadcast %216 : vector<8x1xf32> to vector<8x32xf32>
    %218 = arith.subf %210, %217 : vector<8x32xf32>
    %219 = arith.mulf %218, %218 : vector<8x32xf32>
    %cst_145 = arith.constant dense<0.000000e+00> : vector<8xf32>
    %220 = vector.multi_reduction <add>, %219, %cst_145 [1] : vector<8x32xf32> to vector<8xf32>
    %221 = vector.shape_cast %220 : vector<8xf32> to vector<8x1xf32>
    %cst_146 = arith.constant 3.200000e+01 : f32
    %222 = vector.broadcast %cst_146 : f32 to vector<8x1xf32>
    %223 = arith.divf %221, %222 : vector<8x1xf32>
    %224 = vector.broadcast %216 : vector<8x1xf32> to vector<8x32xf32>
    %225 = arith.subf %210, %224 : vector<8x32xf32>
    %cst_147 = arith.constant 9.99999974E-6 : f32
    %226 = vector.broadcast %cst_147 : f32 to vector<8x1xf32>
    %227 = arith.addf %223, %226 : vector<8x1xf32>
    %228 = math.rsqrt %227 : vector<8x1xf32>
    %229 = vector.broadcast %228 : vector<8x1xf32> to vector<8x32xf32>
    %230 = arith.mulf %225, %229 : vector<8x32xf32>
    %231 = vector.broadcast %211 : vector<1x32xf32> to vector<8x32xf32>
    %232 = arith.mulf %230, %231 : vector<8x32xf32>
    %233 = vector.broadcast %212 : vector<1x32xf32> to vector<8x32xf32>
    %234 = arith.addf %232, %233 : vector<8x32xf32>
    %235 = vector.shape_cast %234 : vector<8x32xf32> to vector<1x8x32xf32>
    %c0_148 = arith.constant 0 : index
    %c0_149 = arith.constant 0 : index
    %c0_150 = arith.constant 0 : index
    %236 = vector.load %arg19[%c0_148, %c0_149, %c0_150] : memref<1x8x32xf32, #tpu.memory_space<vmem>>, vector<1x8x32xf32>
    tpu.vector_store %arg19[%c0_148, %c0_149, %c0_150], %235 {strides = array<i32>} : memref<1x8x32xf32, #tpu.memory_space<vmem>>, vector<1x8x32xf32>,
    return
  }
  func.func @transform_0(%arg0: i32) -> (i32, i32, i32) {
    %c0_i32 = arith.constant 0 : i32
    %c0_i32_0 = arith.constant 0 : i32
    %c0_i32_1 = arith.constant 0 : i32
    return %arg0, %c0_i32, %c0_i32_0 : i32, i32, i32
  }
  func.func @transform_1(%arg0: i32) -> (i32, i32) {
    %c0_i32 = arith.constant 0 : i32
    %c0_i32_0 = arith.constant 0 : i32
    %c0_i32_1 = arith.constant 0 : i32
    return %c0_i32, %c0_i32_0 : i32, i32
  }
  func.func @transform_2(%arg0: i32) -> (i32, i32, i32) {
    %c0_i32 = arith.constant 0 : i32
    %c0_i32_0 = arith.constant 0 : i32
    %c0_i32_1 = arith.constant 0 : i32
    %c0_i32_2 = arith.constant 0 : i32
    return %c0_i32, %c0_i32_0, %c0_i32_1 : i32, i32, i32
  }
  func.func @transform_3(%arg0: i32) -> (i32, i32, i32) {
    %c0_i32 = arith.constant 0 : i32
    %c0_i32_0 = arith.constant 0 : i32
    %c0_i32_1 = arith.constant 0 : i32
    %c0_i32_2 = arith.constant 0 : i32
    return %c0_i32, %c0_i32_0, %c0_i32_1 : i32, i32, i32
  }
  func.func @transform_4(%arg0: i32) -> (i32, i32, i32) {
    %c0_i32 = arith.constant 0 : i32
    %c0_i32_0 = arith.constant 0 : i32
    %c0_i32_1 = arith.constant 0 : i32
    %c0_i32_2 = arith.constant 0 : i32
    return %c0_i32, %c0_i32_0, %c0_i32_1 : i32, i32, i32
  }
  func.func @transform_5(%arg0: i32) -> (i32, i32, i32) {
    %c0_i32 = arith.constant 0 : i32
    %c0_i32_0 = arith.constant 0 : i32
    %c0_i32_1 = arith.constant 0 : i32
    %c0_i32_2 = arith.constant 0 : i32
    return %c0_i32, %c0_i32_0, %c0_i32_1 : i32, i32, i32
  }
  func.func @transform_6(%arg0: i32) -> (i32, i32, i32) {
    %c0_i32 = arith.constant 0 : i32
    %c0_i32_0 = arith.constant 0 : i32
    %c0_i32_1 = arith.constant 0 : i32
    %c0_i32_2 = arith.constant 0 : i32
    return %c0_i32, %c0_i32_0, %c0_i32_1 : i32, i32, i32
  }
  func.func @transform_7(%arg0: i32) -> (i32, i32, i32) {
    %c0_i32 = arith.constant 0 : i32
    %c0_i32_0 = arith.constant 0 : i32
    %c0_i32_1 = arith.constant 0 : i32
    %c0_i32_2 = arith.constant 0 : i32
    return %c0_i32, %c0_i32_0, %c0_i32_1 : i32, i32, i32
  }
  func.func @transform_8(%arg0: i32) -> (i32, i32, i32) {
    %c0_i32 = arith.constant 0 : i32
    %c0_i32_0 = arith.constant 0 : i32
    %c0_i32_1 = arith.constant 0 : i32
    %c0_i32_2 = arith.constant 0 : i32
    return %c0_i32, %c0_i32_0, %c0_i32_1 : i32, i32, i32
  }
  func.func @transform_9(%arg0: i32) -> (i32, i32) {
    %c0_i32 = arith.constant 0 : i32
    %c0_i32_0 = arith.constant 0 : i32
    %c0_i32_1 = arith.constant 0 : i32
    return %c0_i32, %c0_i32_0 : i32, i32
  }
  func.func @transform_10(%arg0: i32) -> (i32, i32) {
    %c0_i32 = arith.constant 0 : i32
    %c0_i32_0 = arith.constant 0 : i32
    %c0_i32_1 = arith.constant 0 : i32
    return %c0_i32, %c0_i32_0 : i32, i32
  }
  func.func @transform_11(%arg0: i32) -> (i32, i32) {
    %c0_i32 = arith.constant 0 : i32
    %c0_i32_0 = arith.constant 0 : i32
    %c0_i32_1 = arith.constant 0 : i32
    return %c0_i32, %c0_i32_0 : i32, i32
  }
  func.func @transform_12(%arg0: i32) -> (i32, i32) {
    %c0_i32 = arith.constant 0 : i32
    %c0_i32_0 = arith.constant 0 : i32
    %c0_i32_1 = arith.constant 0 : i32
    return %c0_i32, %c0_i32_0 : i32, i32
  }
  func.func @transform_13(%arg0: i32) -> (i32, i32) {
    %c0_i32 = arith.constant 0 : i32
    %c0_i32_0 = arith.constant 0 : i32
    %c0_i32_1 = arith.constant 0 : i32
    return %c0_i32, %c0_i32_0 : i32, i32
  }
  func.func @transform_14(%arg0: i32) -> (i32, i32) {
    %c0_i32 = arith.constant 0 : i32
    %c0_i32_0 = arith.constant 0 : i32
    %c0_i32_1 = arith.constant 0 : i32
    return %c0_i32, %c0_i32_0 : i32, i32
  }
  func.func @transform_15(%arg0: i32) -> (i32, i32) {
    %c0_i32 = arith.constant 0 : i32
    %c0_i32_0 = arith.constant 0 : i32
    %c0_i32_1 = arith.constant 0 : i32
    return %c0_i32, %c0_i32_0 : i32, i32
  }
  func.func @transform_16(%arg0: i32) -> (i32, i32) {
    %c0_i32 = arith.constant 0 : i32
    %c0_i32_0 = arith.constant 0 : i32
    %c0_i32_1 = arith.constant 0 : i32
    return %c0_i32, %c0_i32_0 : i32, i32
  }
  func.func @transform_17(%arg0: i32) -> (i32, i32) {
    %c0_i32 = arith.constant 0 : i32
    %c0_i32_0 = arith.constant 0 : i32
    %c0_i32_1 = arith.constant 0 : i32
    return %c0_i32, %c0_i32_0 : i32, i32
  }
  func.func @transform_18(%arg0: i32) -> (i32, i32, i32) {
    %c0_i32 = arith.constant 0 : i32
    %c0_i32_0 = arith.constant 0 : i32
    %c0_i32_1 = arith.constant 0 : i32
    return %arg0, %c0_i32, %c0_i32_0 : i32, i32, i32
  }
}

</mosaic_0001>

<bundles_post_ra>
// kernel: tpu_custom_call.1
= control target key start
LH: loop header
LB: loop body
LE: loop exit
PB: predicated region body
PF: predicated region fallthrough
CT: control target
= control target key end

     0   :  { %s7036_s0 = inlined_call_operand.vmem [shape: f32[2,8,32], index: 0, kind: input, shape index: {}]   ;;  %s7037_s1 = inlined_call_operand.vmem [shape: f32[8,32], index: 1, kind: input, shape index: {}]   ;;  %s7038_s2 = inlined_call_operand.vmem [shape: f32[4,32,8], index: 2, kind: input, shape index: {}]   ;;  %s7039_s3 = inlined_call_operand.vmem [shape: f32[4,32,8], index: 3, kind: input, shape index: {}]   ;;  %s7040_s4 = inlined_call_operand.vmem [shape: f32[4,32,8], index: 4, kind: input, shape index: {}]   ;;  %s7041_s5 = inlined_call_operand.vmem [shape: f32[4,1,8], index: 5, kind: input, shape index: {}]   ;;  %s7042_s6 = inlined_call_operand.vmem [shape: f32[4,1,8], index: 6, kind: input, shape index: {}]   ;;  %s7043_s7 = inlined_call_operand.vmem [shape: f32[4,1,8], index: 7, kind: input, shape index: {}]   ;;  %s7044_s8 = inlined_call_operand.vmem [shape: f32[4,8,32], index: 8, kind: input, shape index: {}]   ;;  %s7045_s9 = inlined_call_operand.vmem [shape: f32[1,32], index: 9, kind: input, shape index: {}]   ;;  %s7046_s10 = inlined_call_operand.vmem [shape: f32[1,32], index: 10, kind: input, shape index: {}]   ;;  %s7047_s11 = inlined_call_operand.vmem [shape: f32[1,32], index: 11, kind: input, shape index: {}]   ;;  %s7048_s12 = inlined_call_operand.vmem [shape: f32[32,2048], index: 12, kind: input, shape index: {}]   ;;  %s7049_s13 = inlined_call_operand.vmem [shape: f32[1,2048], index: 13, kind: input, shape index: {}]   ;;  %s7050_s14 = inlined_call_operand.vmem [shape: f32[2048,32], index: 14, kind: input, shape index: {}]   ;;  %s7051_s15 = inlined_call_operand.vmem [shape: f32[1,32], index: 15, kind: input, shape index: {}]   ;;  %s7052_s16 = inlined_call_operand.vmem [shape: f32[1,32], index: 16, kind: input, shape index: {}]   ;;  %s7053_s17 = inlined_call_operand.vmem [shape: f32[1,32], index: 17, kind: input, shape index: {}]   ;;  %s7054_s18 = inlined_call_operand.hbm [shape: f32[2,8,32], index: 18, kind: output, shape index: {}]  }
   0x1   :  { %7061 = sst [smem:[#allocation10_spill]] %s7036_s0 }
   0x2   :  { %7062 = sst [smem:[#allocation11_spill]] %s7037_s1 }
   0x3   :  { %7063 = sst [smem:[#allocation12_spill]] %s7038_s2 }
   0x4   :  { %7064 = sst [smem:[#allocation13_spill]] %s7039_s3 }
   0x5   :  { %7065 = sst [smem:[#allocation14_spill]] %s7040_s4 }
   0x6   :  { %23 = vsyncpa [#allocation3], 0 }
   0x7   :  { %25 = vsyncpa [#allocation3 + $0x1], 0  ;;  %s5496_s27 = smov 0   ;;  %s5498_s28 = smov 0  }
   0x8   :  { %s5500_s29 = smov 0   ;;  %s5502_s30 = smov 0  }
   0x9 LB: > { %7066 = sst [smem:[#allocation5_spill]] %s5383_s27  ;;  %s5517_s0 = sadd.s32 4294967295, %s5395_s30   ;;  %s5395_s30 = sphi %s5502_s30, %s7080_s30   ;;  %s5391_s29 = sphi %s5500_s29, %s7082_s29   ;;  %s5387_s28 = sphi %s5498_s28, %s7084_s28   ;;  %s5383_s27 = sphi %s5496_s27, %s7083_s27  }
   0xa   : > { %7067 = sst [smem:[#allocation6_spill]] %s5391_s29  ;;  %s4211_s19 = sadd.s32 4294967294, %s5395_s30  }
   0xb   : > { %s5521_s1 = sadd.s32 1, %s5395_s30   ;;  %s421_s20 = sadd.s32 1, %s5391_s29 }
   0xc   : > { %7068 = sst [smem:[#allocation7_spill]] %s5521_s1  ;;  %s418_s21 = ssub.s32 %s5395_s30, %s5521_s1 }
   0xd   : > { %p431_p0 = scmp.ne.s32.totalorder %s5391_s29, %s5387_s28  ;;  %p419_p1 = scmp.eq.s32.totalorder %s418_s21, 0 }
   0xe   : > { %p432_p2 = scmp.eq.s32.totalorder %s5517_s0, 1  ;;  %p437_p3 = scmp.ne.s32.totalorder %s5387_s28, %s5383_s27 }
   0xf   : > { %p438_p4 = scmp.eq.s32.totalorder %s4211_s19, 1  ;;  %p4214_p7 = scmp.ge.s32.totalorder %s5395_s30, 1 }
  0x10   : > { %s5532_s22 = scalar_select %p419_p1, %s5391_s29, %s421_s20  }
  0x11   : > { %p5534_p5 = por %p432_p2, %p431_p0  ;;  %p5538_p6 = por %p438_p4, %p437_p3 }
  0x12   : > { %7069 = sst [smem:[#allocation8_spill]] %s5532_s22  ;;  %p514_p8 = scmp.lt.s32.totalorder %s5395_s30, 3 }
  0x13   : > { %s7071_s23 = scalar_select %p5538_p6, 1, 0 }
  0x14   : > { %p515_p9 = pnand %p4214_p7, %p514_p8 }
  0x15   : > { %7072 = sst [smem:[#allocation9_spill]] %s7071_s23  ;;  %s7073_s3 = sld [smem:[#allocation13_spill]] (!%p515_p9)  ;;  %v5397_v3 = vmov (!%p515_p9), 0.0|0.0   ;;  %vm5398_vm0 = vmmov (!%p515_p9), 0   ;;  %v5399_v11 = vmov (!%p515_p9), 0.0   ;;  %vm585_vm1 = vcmask (!%p515_p9), 261120  }
  0x16   : > { %518 = sbr.rel (%p515_p9) target bundleno = 5059 (0x13c3), region = 92  ;;  %s7074_s22 = sld [smem:[#allocation12_spill]] (!%p515_p9)  ;;  %4885 = vmatprep.subr.bf16.mxu1 (!%p515_p9), %v5397_v3  ;;  %4879 = vmatprep.subr.bf16.mxu0 (!%p515_p9), %v5397_v3  ;;  %v4219_v17 = vld [vmem:[%s7042_s6] ss:$0 sm:$0xff] (!%p515_p9)  ;;  %vm821_vm2 = vcmask (!%p515_p9), 64512  }
  0x17   : > { %p567_p10 = scmp.lt.s32.totalorder (!%p515_p9), %s5517_s0, 1  ;;  %4706 = vmatprep.mubr.msk.f32.mxu1 (!%p515_p9), %vm5398_vm0, %v5399_v11  ;;  %4695 = vmatprep.mubr.msk.f32.mxu0 (!%p515_p9), %vm5398_vm0, %v5399_v11  ;;  %s7075_s24 = sld [smem:[#allocation11_spill]] (!%p515_p9)  ;;  %v4217_v18 = vld [vmem:[%s7041_s5] ss:$0 sm:$0xff] (!%p515_p9)  ;;  %v4238_v62 = vld [vmem:[%s7042_s6 + $0x1] ss:$0 sm:$0xff] (!%p515_p9) }
  0x18   : > { %s7076_s19 = sld [smem:[#allocation10_spill]] (!%p515_p9)  ;;  %s7077_s4 = sld [smem:[#allocation14_spill]] (!%p515_p9)  ;;  %v4221_v40 = vld [vmem:[%s7043_s7] ss:$0 sm:$0xff] (!%p515_p9)  ;;  %v4231_v63 = vld [vmem:[%s7041_s5 + $0x1] ss:$0 sm:$0xff] (!%p515_p9) }
  0x19   : > { %s564_s21 = sand.u32 (!%p515_p9), 1, %s5387_s28   ;;  %s4320_s23 = sshll.u32 (!%p515_p9), %s5517_s0, 7 }
  0x1b   : > { %v659_v0 = vld [vmem:[%s7073_s3] sm:$0xff] (!%p515_p9)  ;;  %v660_v1 = vld [vmem:[%s7073_s3 + $0x8] sm:$0xff] (!%p515_p9)  ;;  %v661_v6 = vld [vmem:[%s7073_s3 + $0x10] sm:$0xff] (!%p515_p9) }
  0x1c   : > { %v574_v2 = vld [vmem:[%s7074_s22] sm:$0xff] (!%p515_p9)  ;;  %v4886_v4 = vpack.c.bf16 (!%p515_p9), %v660_v1, %v659_v0  ;;  %v575_v5 = vld [vmem:[%s7074_s22 + $0x8] sm:$0xff] (!%p515_p9)  ;;  %v662_v7 = vld [vmem:[%s7073_s3 + $0x18] sm:$0xff] (!%p515_p9) }
  0x1d   : > { %v4880_v8 = vpack.c.bf16 %v575_v5, %v574_v2  ;;  %v576_v9 = vld [vmem:[%s7074_s22 + $0x10] sm:$0xff]  ;;  %v577_v10 = vld [vmem:[%s7074_s22 + $0x18] sm:$0xff]  ;;  %v4889_v12 = vpack.c.bf16 %v662_v7, %v661_v6  ;;  %s568_s29 = scalar_select %p567_p10, %s5517_s0, 1  ;;  %v572_v14 = vld [vmem:[%s7075_s24] sm:$0xff] }
  0x1e   : > { %4887 = vmatpush3.bf16.msra.mxu1 %v4886_v4  ;;  %v4883_v13 = vpack.c.bf16 %v577_v10, %v576_v9  ;;  %v740_v25 = vld [vmem:[%s7077_s4] sm:$0xff]  ;;  %v741_v26 = vld [vmem:[%s7077_s4 + $0x8] sm:$0xff]  ;;  %v742_v27 = vld [vmem:[%s7077_s4 + $0x10] sm:$0xff]  ;;  %s5400_s0 = smov [#allocation2]  }
  0x1f   : > { %4881 = vmatpush3.bf16.msra.mxu0 %v4880_v8  ;;  %4888 = vmatprep.subr.bf16.mxu1 %v5397_v3  ;;  %s4216_s1 = sshll.u32 %s568_s29, 3  ;;  %v4892_v28 = vpack.c.bf16 %v741_v26, %v740_v25  ;;  %v743_v29 = vld [vmem:[%s7077_s4 + $0x18] sm:$0xff]  ;;  %v4226_v43 = vld [vmem:[%s7074_s22 + $0x20] sm:$0xff]  ;;  %v4227_v44 = vld [vmem:[%s7074_s22 + $0x28] sm:$0xff]  ;;  %s4139_s29 = scalar_lea.sflag [#allocation3], %s564_s21 }
  0x20   : > { %4882 = vmatprep.subr.bf16.mxu0 %v5397_v3  ;;  %s570_s20 = scalar_lea.vmem %s7076_s19, %s4216_s1  ;;  %v4895_v30 = vpack.c.bf16 %v743_v29, %v742_v27  ;;  %v4898_v45 = vpack.c.bf16 %v4227_v44, %v4226_v43  ;;  %v4228_v46 = vld [vmem:[%s7074_s22 + $0x30] sm:$0xff]  ;;  %v4229_v47 = vld [vmem:[%s7074_s22 + $0x38] sm:$0xff]  ;;  %v4233_v50 = vld [vmem:[%s7073_s3 + $0x20] sm:$0xff] }
  0x21   : > { %v571_v15 = vld [vmem:[%s570_s20] sm:$0xff]  ;;  %v4901_v48 = vpack.c.bf16 %v4229_v47, %v4228_v46  ;;  %v4234_v51 = vld [vmem:[%s7073_s3 + $0x28] sm:$0xff]  ;;  %v4235_v55 = vld [vmem:[%s7073_s3 + $0x30] sm:$0xff]  ;;  %s6993_s20 = scalar_lea.hbm %s7054_s18, %s4320_s23 }
  0x22   : > { %4890 = vmatpush3.bf16.msra.mxu1 %v4889_v12  ;;  %v5584_v16 = vadd.f32 %v572_v14, %v571_v15  ;;  %v4904_v53 = vpack.c.bf16 %v4234_v51, %v4233_v50  ;;  %v4236_v56 = vld [vmem:[%s7073_s3 + $0x38] sm:$0xff]  ;;  %v4240_v5 = vld [vmem:[%s7077_s4 + $0x20] sm:$0xff]  ;;  %v4241_v6 = vld [vmem:[%s7077_s4 + $0x28] sm:$0xff] }
  0x23   : > { %4884 = vmatpush3.bf16.msra.mxu0 %v4883_v13  ;;  %4720 = vmatprep.subr.mxu1 %v5399_v11  ;;  %v4907_v57 = vpack.c.bf16 %v4236_v56, %v4235_v55  ;;  %v4242_v7 = vld [vmem:[%s7077_s4 + $0x30] sm:$0xff]  ;;  %v4910_v8 = vpack.c.bf16 %v4241_v6, %v4240_v5  ;;  %v4243_v9 = vld [vmem:[%s7077_s4 + $0x38] sm:$0xff]  ;;  %v4250_v25 = vld [vmem:[%s7044_s8 + $0x8] sm:$0xff] }
  0x24   : > { %4891 = vmatprep.subr.bf16.mxu0 %v5397_v3  ;;  %v4913_v10 = vpack.c.bf16 %v4243_v9, %v4242_v7  ;;  %v982_v29 = vld [vmem:[%s7044_s8] sm:$0xff] }
  0x25   : > { %4707 = vmatmul.mubr.msk.f32.vlgmr.msra.gmra.mrb[0].mxu1 %vm585_vm1, %v5584_v16  ;;  %v4265_v46 = vld [vmem:[%s7042_s6 + $0x2] ss:$0 sm:$0xff] }
  0x26   : > { %4696 = vmatmul.mubr.msk.f32.vlgmr.msra.gmra.mrb[0].mxu0 %vm585_vm1, %v5584_v16  ;;  %4722 = vmatprep.mubr.msk.f32.mxu1 %vm5398_vm0, %v5399_v11  ;;  %v4272_v9 = vld [vmem:[%s7043_s7 + $0x2] ss:$0 sm:$0xff] }
  0x27   : > { %4717 = vmatprep.mubr.msk.f32.mxu0 %vm5398_vm0, %v5399_v11  ;;  %4893 = vmatpush3.bf16.msra.mxu0 %v4892_v28 }
  0x28   : > { %4894 = vmatprep.subr.bf16.mxu0 %v5397_v3 }
  0x2b   : > { %4896 = vmatpush3.bf16.msra.mxu0 %v4895_v30  ;;  %v4260_v30 = vld [vmem:[%s7073_s3 + $0x40] sm:$0xff] }
  0x2c   : > { %4897 = vmatprep.subr.bf16.mxu0 %v5397_v3 }
  0x2e   : > { %4718 = vmatmul.mubr.msk.f32.vlgmr.msra.gmra.mrb[2].mxu0 %vm585_vm1, %v5584_v16 }
  0x2f   : > { %4738 = vmatprep.mubr.msk.f32.mxu0 %vm5398_vm0, %v5399_v11  ;;  %4899 = vmatpush3.bf16.msra.mxu0 %v4898_v45 }
  0x30   : > { %4900 = vmatprep.subr.bf16.mxu0 %v5397_v3 }
  0x33   : > { %4902 = vmatpush3.bf16.msra.mxu0 %v4901_v48 }
  0x34   : > { %4909 = vmatprep.subr.bf16.mxu0 %v5397_v3 }
  0x36   : > { %4739 = vmatmul.mubr.msk.f32.vlgmr.msra.gmra.mrb[4].mxu0 %vm585_vm1, %v5584_v16 }
  0x37   : > { %4760 = vmatprep.mubr.msk.f32.mxu0 %vm5398_vm0, %v5399_v11  ;;  %4911 = vmatpush3.bf16.msra.mxu0 %v4910_v8 }
  0x38   : > { %4912 = vmatprep.subr.bf16.mxu0 %v5397_v3 }
  0x3b   : > { %4914 = vmatpush3.bf16.msra.mxu0 %v4913_v10 }
  0x3c   : > { %4773 = vmatprep.subr.mxu0 %v5399_v11 }
  0x3e   : > { %4761 = vmatmul.mubr.msk.f32.vlgmr.msra.gmra.mrb[6].mxu0 %vm585_vm1, %v5584_v16 }
  0x3f   : > { %4775 = vmatprep.mubr.msk.f32.mxu0 %vm5398_vm0, %v5399_v11  ;;  %4774 = vmatpush3.msra.mxu0 %v4250_v25  ;;  %v4287_v25 = vld [vmem:[%s7073_s3 + $0x68] sm:$0xff] }
  0x40   : > { %4915 = vmatprep.subr.bf16.mxu0 %v5397_v3 }
  0xf8   : > { %v736_v19 = vpop.f32.mrb[0].mxu1 }
  0xf9   : > { %v737_v20 = vadd.f32 %v4219_v17, %v736_v19  ;;  %v4708_v21 = vpop.f32.mrb[1].mxu1  ;;  %v655_v22 = vpop.f32.mrb[0].mxu0 }
  0xfa   : > { %v656_v23 = vadd.f32 %v4217_v18, %v655_v22  ;;  %v4697_v24 = vpop.f32.mrb[1].mxu0  ;;  %v4245_v22 = vld [vmem:[%s7043_s7 + $0x1] ss:$0 sm:$0xff] }
  0xfb   : > { %4721 = vmatpush3.xpose.msk.msra.mxu1 %vm821_vm2, %v737_v20 }
  0xfc   : > { %4725 = vmatprep.subr.mxu1 %v5399_v11 }
  0xfe   : > { %4723 = vmatmul.mubr.msk.f32.vlgmr.msra.gmra.mrb[2].mxu1 %vm821_vm2, %v656_v23 }
  0xff   : > { %4727 = vmatprep.mubr.msk.f32.mxu1 %vm5398_vm0, %v5399_v11 }
 0x101   : > { %v817_v39 = vpop.f32.mrb[2].mxu0 }
 0x102   : > { %v4719_v41 = vpop.f32.mrb[3].mxu0  ;;  %v818_v42 = vadd.f32 %v4221_v40, %v817_v39  ;;  %v4255_v39 = vld [vmem:[%s7074_s22 + $0x50] sm:$0xff]  ;;  %v4256_v40 = vld [vmem:[%s7074_s22 + $0x58] sm:$0xff] }
 0x103   : > { %v4919_v43 = vpack.c.bf16 %v4256_v40, %v4255_v39 }
 0x104   : > { %4726 = vmatpush3.msra.mxu1 %v818_v42 }
 0x105   : > { %4903 = vmatprep.subr.bf16.mxu1 %v5397_v3 }
 0x109   : > { %v1062_v58 = vpop.f32.mrb[4].mxu0 }
 0x10a   : > { %v4740_v59 = vpop.f32.mrb[5].mxu0  ;;  %v1063_v4 = vadd.f32 %v4231_v63, %v1062_v58  ;;  %v4268_v58 = vld [vmem:[%s7077_s4 + $0x48] sm:$0xff] }
 0x10b   : > { %v4269_v59 = vld [vmem:[%s7077_s4 + $0x50] sm:$0xff] }
 0x111   : > { %v1228_v21 = vpop.f32.mrb[6].mxu0 }
 0x112   : > { %v4762_v23 = vpop.f32.mrb[7].mxu0  ;;  %v1229_v24 = vadd.f32 %v4245_v22, %v1228_v21  ;;  %v4281_v21 = vld [vmem:[%s7074_s22 + $0x70] sm:$0xff]  ;;  %v4282_v22 = vld [vmem:[%s7074_s22 + $0x78] sm:$0xff] }
 0x113   : > { %v4937_v23 = vpack.c.bf16 %v4282_v22, %v4281_v21  ;;  %v2549_v21 = vld [vmem:[%s7048_s12] sm:$0xff] }
 0x114   : > { %v2565_v22 = vld [vmem:[%s7048_s12 + $0x80] sm:$0xff] }
 0x1d1   : > { %v894_v31 = vpop.f32.mrb[2].mxu1 }
 0x1d2   : > { %v4724_v32 = vpop.f32.mrb[3].mxu1  ;;  %v898_v33 = vsel %vm821_vm2, %v894_v31, -inf }
 0x1d3   : > { %899 = vmax.xlane.f32.xlu0 %v898_v33  ;;  %v4262_v33 = vld [vmem:[%s7073_s3 + $0x50] sm:$0xff] }
 0x260   : > { %v900_v34 = vpop.xlane.xlu0 %899 }
 0x261   : > { %v901_v35 = vsub.f32 %v894_v31, %v900_v34  ;;  %v4261_v31 = vld [vmem:[%s7073_s3 + $0x48] sm:$0xff]  ;;  %v4263_v34 = vld [vmem:[%s7073_s3 + $0x58] sm:$0xff] }
 0x262   : > { %v4922_v32 = vpack.c.bf16 %v4261_v31, %v4260_v30 }
 0x263   : > { %v902_v36 = vmul.f32 1.442695, %v901_v35  ;;  %v4925_v35 = vpack.c.bf16 %v4263_v34, %v4262_v33 }
 0x265   : > { %5313 = vpow2.f32 %v902_v36  ;;  %v4253_v36 = vld [vmem:[%s7074_s22 + $0x40] sm:$0xff] }
 0x26f   : > { %v5314_v37 = vpop.eup %5313 }
 0x270   : > { %v904_v38 = vsel %vm821_vm2, %v5314_v37, 0.0 }
 0x271   : > { %905 = vadd.xlane.f32.xlu0 %v904_v38 }
 0x2fe   : > { %v906_v49 = vpop.xlane.xlu0 %905 }
 0x2ff   : > { %5315 = vrcp.f32 %v906_v49 }
 0x309   : > { %v5316_v52 = vpop.eup %5315 }
 0x30a   : > { %v908_v54 = vmul.f32 %v5316_v52, %v5314_v37  ;;  %v4254_v37 = vld [vmem:[%s7074_s22 + $0x48] sm:$0xff] }
 0x30b   : > { %v4916_v38 = vpack.c.bf16 %v4254_v37, %v4253_v36  ;;  %v4291_v37 = vld [vmem:[%s7042_s6 + $0x3] ss:$0 sm:$0xff] }
 0x30c   : > { %4728 = vmatmul.mubr.msk.f32.vlgmr.msra.gmra.mrb[4].mxu1 %vm821_vm2, %v908_v54 }
 0x30d   : > { %4905 = vmatpush3.bf16.msra.mxu1 %v4904_v53  ;;  %4749 = vmatprep.mubr.msk.f32.mxu1 %vm5398_vm0, %v5399_v11  ;;  %v4258_v53 = vld [vmem:[%s7041_s5 + $0x2] ss:$0 sm:$0xff] }
 0x30e   : > { %4906 = vmatprep.subr.bf16.mxu1 %v5397_v3 }
 0x311   : > { %4908 = vmatpush3.bf16.msra.mxu1 %v4907_v57  ;;  %v4267_v57 = vld [vmem:[%s7077_s4 + $0x40] sm:$0xff] }
 0x312   : > { %4763 = vmatprep.subr.mxu1 %v5399_v11 }
 0x314   : > { %4750 = vmatmul.mubr.msk.f32.vlgmr.msra.gmra.mrb[6].mxu1 %vm585_vm1, %v5584_v16 }
 0x315   : > { %4765 = vmatprep.mubr.msk.f32.mxu1 %vm5398_vm0, %v5399_v11 }
 0x3df   : > { %v978_v60 = vpop.f32.mrb[4].mxu1 }
 0x3e0   : > { %v4729_v61 = vpop.f32.mrb[5].mxu1 }
 0x3e1   : > { %v4270_v61 = vld [vmem:[%s7077_s4 + $0x58] sm:$0xff] }
 0x3e7   : > { %v1145_v0 = vpop.f32.mrb[6].mxu1 }
 0x3e8   : > { %v1146_v1 = vadd.f32 %v4238_v62, %v1145_v0  ;;  %v4751_v2 = vpop.f32.mrb[7].mxu1  ;;  %v4931_v62 = vpack.c.bf16 %v4270_v61, %v4269_v59 }
 0x3ea   : > { %4764 = vmatpush3.xpose.msk.msra.mxu1 %vm821_vm2, %v1146_v1 }
 0x3eb   : > { %4768 = vmatprep.subr.mxu1 %v5399_v11 }
 0x3ed   : > { %4766 = vmatmul.mubr.msk.f32.vlgmr.msra.gmra.mrb[8].mxu1 %vm821_vm2, %v1063_v4 }
 0x3ee   : > { %4770 = vmatprep.mubr.msk.f32.mxu1 %vm5398_vm0, %v5399_v11  ;;  %4769 = vmatpush3.msra.mxu1 %v1229_v24  ;;  %v4286_v24 = vld [vmem:[%s7073_s3 + $0x60] sm:$0xff] }
 0x3ef   : > { %4778 = vmatprep.subr.mxu1 %v5399_v11 }
 0x4c0   : > { %v1304_v12 = vpop.f32.mrb[8].mxu1 }
 0x4c1   : > { %v4767_v13 = vpop.f32.mrb[9].mxu1  ;;  %v1308_v14 = vsel %vm821_vm2, %v1304_v12, -inf }
 0x4c2   : > { %1309 = vmax.xlane.f32.xlu1 %v1308_v14  ;;  %v4277_v13 = vld [vmem:[%s7044_s8 + $0x10] sm:$0xff] }
 0x54f   : > { %v1310_v15 = vpop.xlane.xlu1 %1309 }
 0x550   : > { %v1311_v17 = vsub.f32 %v1304_v12, %v1310_v15 }
 0x552   : > { %v1312_v18 = vmul.f32 1.442695, %v1311_v17 }
 0x554   : > { %5317 = vpow2.f32 %v1312_v18  ;;  %v4279_v18 = vld [vmem:[%s7074_s22 + $0x60] sm:$0xff] }
 0x55e   : > { %v5318_v19 = vpop.eup %5317 }
 0x55f   : > { %v1314_v20 = vsel %vm821_vm2, %v5318_v19, 0.0 }
 0x560   : > { %1315 = vadd.xlane.f32.xlu1 %v1314_v20 }
 0x5ed   : > { %v1316_v26 = vpop.xlane.xlu1 %1315 }
 0x5ee   : > { %5319 = vrcp.f32 %v1316_v26  ;;  %v4940_v26 = vpack.c.bf16 %v4287_v25, %v4286_v24  ;;  %v4953_v24 = vpack.c.bf16 %v2565_v22, %v2549_v21  ;;  %v2551_v25 = vld [vmem:[%s7048_s12 + $0x10] sm:$0xff]  ;;  %v2606_v21 = vld [vmem:[%s7048_s12 + $0x1c8] sm:$0xff]  ;;  %v2592_v22 = vld [vmem:[%s7048_s12 + $0x158] sm:$0xff] }
 0x5f8   : > { %v5320_v27 = vpop.eup %5319 }
 0x5f9   : > { %v1318_v28 = vmul.f32 %v5320_v27, %v5318_v19  ;;  %v4280_v19 = vld [vmem:[%s7074_s22 + $0x68] sm:$0xff]  ;;  %v4288_v27 = vld [vmem:[%s7073_s3 + $0x70] sm:$0xff] }
 0x5fa   : > { %v4934_v20 = vpack.c.bf16 %v4280_v19, %v4279_v18  ;;  %v2566_v18 = vld [vmem:[%s7048_s12 + $0x88] sm:$0xff] }
 0x5fb   : > { %4771 = vmatmul.mubr.msk.f32.vlgmr.msra.gmra.mrb[10].mxu1 %vm821_vm2, %v1318_v28  ;;  %v4289_v28 = vld [vmem:[%s7073_s3 + $0x78] sm:$0xff]  ;;  %s4215_s3 = sshll.u32 %s564_s21, 3 }
 0x5fc   : > { %4779 = vmatpush3.msra.mxu1 %v982_v29  ;;  %4780 = vmatprep.mubr.msk.f32.mxu1 %vm5398_vm0, %v5399_v11  ;;  %v4943_v31 = vpack.c.bf16 %v4289_v28, %v4288_v27  ;;  %v2582_v28 = vld [vmem:[%s7048_s12 + $0x108] sm:$0xff]  ;;  %s566_s24 = scalar_lea.vmem [#allocation2], %s4215_s3  ;;  %s5337_s3 = sshll.u32 %s5400_s0, 4  ;;  %s5338_s3 = int_to_ptr.vmem [resolvable:$false] %s5337_s3 }
 0x5fd   : > { %4921 = vmatprep.subr.bf16.mxu1 %v5397_v3  ;;  %s4152_s25 = sshll.u32 %s566_s24, 4  ;;  %s6995_s25 = int_to_ptr.vmem [resolvable:$true] %s4152_s25 }
 0x5fe   : > { %s5333_s1 = scalar_lea.vmem %s6995_s25, 128  ;;  %p5340_p0 = scmp.lt.s32.totalorder %s6995_s25, %s5338_s3 }
 0x5ff   : > { %4781 = vmatmul.mubr.msk.f32.vlgmr.msra.gmra.mrb[12].mxu1 %vm821_vm2, %v978_v60  ;;  %v4928_v60 = vpack.c.bf16 %v4268_v58, %v4267_v57  ;;  %v4298_v57 = vld [vmem:[%s7043_s7 + $0x3] ss:$0 sm:$0xff]  ;;  %p5334_p11 = scmp.ne.s32.totalorder %s6995_s25, %s5333_s1 }
 0x600   : > { %4923 = vmatpush3.bf16.msra.mxu1 %v4922_v32  ;;  %4802 = vmatprep.mubr.msk.f32.mxu1 %vm5398_vm0, %v5399_v11 }
 0x601   : > { %4924 = vmatprep.subr.bf16.mxu1 %v5397_v3  ;;  %p5335_p12 = pnand %p5334_p11, %p5534_p5 }
 0x603   : > { %p5336_p13 = pneg %p5335_p12 }
 0x604   : > { %4926 = vmatpush3.bf16.msra.mxu1 %v4925_v35 }
 0x605   : > { %4816 = vmatprep.subr.mxu1 %v5399_v11 }
 0x607   : > { %4803 = vmatmul.mubr.msk.f32.vlgmr.msra.gmra.mrb[14].mxu1 %vm585_vm1, %v5584_v16 }
 0x608   : > { %4818 = vmatprep.mubr.msk.f32.mxu1 %vm5398_vm0, %v5399_v11 }
 0x6ce   : > { %v1388_v41 = vpop.f32.mrb[10].mxu1 }
 0x6cf   : > { %v4772_v42 = vpop.f32.mrb[11].mxu1  ;;  %4776 = vmatmul.mubr.msk.f32.vlgmr.msra.gmra.mrb[8].mxu0 %vm821_vm2, %v1388_v41 }
 0x6d0   : > { %4917 = vmatpush3.bf16.msra.mxu0 %v4916_v38  ;;  %4791 = vmatprep.mubr.msk.f32.mxu0 %vm5398_vm0, %v5399_v11  ;;  %v4284_v38 = vld [vmem:[%s7041_s5 + $0x3] ss:$0 sm:$0xff] }
 0x6d1   : > { %4918 = vmatprep.subr.bf16.mxu0 %v5397_v3 }
 0x6d2   : > { %v1536_v44 = vpop.f32.mrb[12].mxu1 }
 0x6d3   : > { %v4782_v45 = vpop.f32.mrb[13].mxu1 }
 0x6d4   : > { %4920 = vmatpush3.bf16.msra.mxu0 %v4919_v43  ;;  %v4293_v43 = vld [vmem:[%s7077_s4 + $0x60] sm:$0xff]  ;;  %v4295_v45 = vld [vmem:[%s7077_s4 + $0x70] sm:$0xff] }
 0x6d5   : > { %4927 = vmatprep.subr.bf16.mxu0 %v5397_v3 }
 0x6d7   : > { %4792 = vmatmul.mubr.msk.f32.vlgmr.msra.gmra.mrb[10].mxu0 %vm585_vm1, %v5584_v16 }
 0x6d8   : > { %4813 = vmatprep.mubr.msk.f32.mxu0 %vm5398_vm0, %v5399_v11  ;;  %4929 = vmatpush3.bf16.msra.mxu0 %v4928_v60  ;;  %v4303_v60 = vld [vmem:[%s7044_s8 + $0x18] sm:$0xff] }
 0x6d9   : > { %4930 = vmatprep.subr.bf16.mxu0 %v5397_v3 }
 0x6da   : > { %v1702_v47 = vpop.f32.mrb[14].mxu1 }
 0x6db   : > { %v1703_v48 = vadd.f32 %v4265_v46, %v1702_v47  ;;  %v4804_v49 = vpop.f32.mrb[15].mxu1  ;;  %v4296_v47 = vld [vmem:[%s7077_s4 + $0x78] sm:$0xff] }
 0x6dc   : > { %4932 = vmatpush3.bf16.msra.mxu0 %v4931_v62 }
 0x6dd   : > { %4817 = vmatpush3.xpose.msk.msra.mxu1 %vm821_vm2, %v1703_v48  ;;  %4826 = vmatprep.subr.mxu0 %v5399_v11  ;;  %v4949_v48 = vpack.c.bf16 %v4296_v47, %v4295_v45 }
 0x6de   : > { %4821 = vmatprep.subr.mxu1 %v5399_v11 }
 0x6df   : > { %4814 = vmatmul.mubr.msk.f32.vlgmr.msra.gmra.mrb[12].mxu0 %vm585_vm1, %v5584_v16 }
 0x6e0   : > { %4828 = vmatprep.mubr.msk.f32.mxu0 %vm5398_vm0, %v5399_v11  ;;  %4827 = vmatpush3.msra.mxu0 %v4277_v13 }
 0x6e1   : > { %4939 = vmatprep.subr.bf16.mxu0 %v5397_v3 }
 0x7a2   : > { %v1463_v50 = vpop.f32.mrb[8].mxu0 }
 0x7a3   : > { %v5763_v51 = vadd.f32 %v1536_v44, %v1463_v50  ;;  %v4777_v52 = vpop.f32.mrb[9].mxu0  ;;  %v4294_v44 = vld [vmem:[%s7077_s4 + $0x68] sm:$0xff]  ;;  %s5339_s4 = scalar_lea.vmem %s5338_s3, 256 }
 0x7a4   : > { %v4946_v46 = vpack.c.bf16 %v4294_v44, %v4293_v43  ;;  %v2572_v44 = vld [vmem:[%s7048_s12 + $0xb8] sm:$0xff]  ;;  %p5341_p1 = scmp.lt.s32.totalorder %s5339_s4, %s5333_s1 }
 0x7a6   : > { %p5342_p2 = por %p5341_p1, %p5340_p0 }
 0x7a8   : > { %p5343_p3 = pnand %p5342_p2, %p5336_p13 }
 0x7aa   : > { %v1619_v54 = vpop.f32.mrb[10].mxu0 }
 0x7ab   : > { %v1620_v55 = vadd.f32 %v4258_v53, %v1619_v54  ;;  %v4793_v56 = vpop.f32.mrb[11].mxu0 }
 0x7ad   : > { %4819 = vmatmul.mubr.msk.f32.vlgmr.msra.gmra.mrb[16].mxu1 %vm821_vm2, %v1620_v55 }
 0x7ae   : > { %4823 = vmatprep.mubr.msk.f32.mxu1 %vm5398_vm0, %v5399_v11 }
 0x7b2   : > { %v1785_v8 = vpop.f32.mrb[12].mxu0 }
 0x7b3   : > { %v4815_v10 = vpop.f32.mrb[13].mxu0  ;;  %v1786_v12 = vadd.f32 %v4272_v9, %v1785_v8 }
 0x7b5   : > { %4822 = vmatpush3.msra.mxu1 %v1786_v12 }
 0x7b6   : > { %4933 = vmatprep.subr.bf16.mxu1 %v5397_v3 }
 0x880   : > { %v1861_v63 = vpop.f32.mrb[16].mxu1 }
 0x881   : > { %v4820_v0 = vpop.f32.mrb[17].mxu1  ;;  %v1865_v1 = vsel %vm821_vm2, %v1861_v63, -inf }
 0x882   : > { %1866 = vmax.xlane.f32.xlu0 %v1865_v1 }
 0x90f   : > { %v1867_v2 = vpop.xlane.xlu0 %1866 }
 0x910   : > { %v1868_v4 = vsub.f32 %v1861_v63, %v1867_v2 }
 0x912   : > { %v1869_v5 = vmul.f32 1.442695, %v1868_v4  ;;  %v4305_v4 = vld [vmem:[%s7045_s9] ss:$0 sm:$0xff] }
 0x914   : > { %5321 = vpow2.f32 %v1869_v5 }
 0x91e   : > { %v5322_v6 = vpop.eup %5321 }
 0x91f   : > { %v1871_v7 = vsel %vm821_vm2, %v5322_v6, 0.0 }
 0x920   : > { %1872 = vadd.xlane.f32.xlu1 %v1871_v7 }
 0x9ad   : > { %v1873_v14 = vpop.xlane.xlu1 %1872 }
 0x9ae   : > { %5323 = vrcp.f32 %v1873_v14 }
 0x9b8   : > { %v5324_v15 = vpop.eup %5323 }
 0x9b9   : > { %v1875_v17 = vmul.f32 %v5324_v15, %v5322_v6 }
 0x9bb   : > { %4824 = vmatmul.mubr.msk.f32.vlgmr.msra.gmra.mrb[18].mxu1 %vm821_vm2, %v1875_v17  ;;  %v2550_v17 = vld [vmem:[%s7048_s12 + $0x8] sm:$0xff] }
 0x9bc   : > { %4839 = vmatprep.mubr.msk.f32.mxu1 %vm5398_vm0, %v5399_v11  ;;  %4935 = vmatpush3.bf16.msra.mxu1 %v4934_v20  ;;  %v4951_v19 = vpack.c.bf16 %v2566_v18, %v2550_v17  ;;  %v2568_v20 = vld [vmem:[%s7048_s12 + $0x98] sm:$0xff] }
 0x9bd   : > { %4936 = vmatprep.subr.bf16.mxu1 %v5397_v3 }
 0x9c0   : > { %4938 = vmatpush3.bf16.msra.mxu1 %v4937_v23 }
 0x9c1   : > { %4945 = vmatprep.subr.bf16.mxu1 %v5397_v3 }
 0x9c3   : > { %4840 = vmatmul.mubr.msk.f32.vlgmr.msra.gmra.mrb[20].mxu1 %vm585_vm1, %v5584_v16 }
 0x9c4   : > { %4861 = vmatprep.mubr.msk.f32.mxu1 %vm5398_vm0, %v5399_v11  ;;  %4947 = vmatpush3.bf16.msra.mxu1 %v4946_v46 }
 0x9c5   : > { %4948 = vmatprep.subr.bf16.mxu1 %v5397_v3 }
 0x9c8   : > { %4950 = vmatpush3.bf16.msra.mxu1 %v4949_v48 }
 0x9c9   : > { %4874 = vmatprep.subr.mxu1 %v5399_v11 }
 0x9cb   : > { %4862 = vmatmul.mubr.msk.f32.vlgmr.msra.gmra.mrb[22].mxu1 %vm585_vm1, %v5584_v16 }
 0x9cc   : > { %4876 = vmatprep.mubr.msk.f32.mxu1 %vm5398_vm0, %v5399_v11  ;;  %4875 = vmatpush3.msra.mxu1 %v4303_v60 }
 0xa8e   : > { %v1945_v29 = vpop.f32.mrb[18].mxu1 }
 0xa8f   : > { %v4825_v30 = vpop.f32.mrb[19].mxu1  ;;  %4829 = vmatmul.mubr.msk.f32.vlgmr.msra.gmra.mrb[14].mxu0 %vm821_vm2, %v1945_v29  ;;  %v2598_v29 = vld [vmem:[%s7048_s12 + $0x188] sm:$0xff] }
 0xa90   : > { %4941 = vmatpush3.bf16.msra.mxu0 %v4940_v26  ;;  %4850 = vmatprep.mubr.msk.f32.mxu0 %vm5398_vm0, %v5399_v11  ;;  %v2567_v26 = vld [vmem:[%s7048_s12 + $0x90] sm:$0xff]  ;;  %v2584_v30 = vld [vmem:[%s7048_s12 + $0x118] sm:$0xff] }
 0xa91   : > { %4942 = vmatprep.subr.bf16.mxu0 %v5397_v3  ;;  %v4961_v27 = vpack.c.bf16 %v2567_v26, %v2551_v25  ;;  %v2589_v26 = vld [vmem:[%s7048_s12 + $0x140] sm:$0xff] }
 0xa94   : > { %4944 = vmatpush3.bf16.msra.mxu0 %v4943_v31  ;;  %v4955_v31 = vpack.c.bf16 %v2598_v29, %v2582_v28 }
 0xa95   : > { %4864 = vmatprep.subr.mxu0 %v5399_v11 }
 0xa96   : > { %v2104_v32 = vpop.f32.mrb[20].mxu1 }
 0xa97   : > { %4851 = vmatmul.mubr.msk.f32.vlgmr.msra.gmra.mrb[16].mxu0 %vm585_vm1, %v5584_v16  ;;  %v4841_v33 = vpop.f32.mrb[21].mxu1  ;;  %v2105_v42 = vadd.f32 %v4284_v38, %v2104_v32  ;;  %v2600_v32 = vld [vmem:[%s7048_s12 + $0x198] sm:$0xff]  ;;  %v2599_v38 = vld [vmem:[%s7048_s12 + $0x190] sm:$0xff] }
 0xa98   : > { %4866 = vmatprep.mubr.msk.f32.mxu0 %vm5398_vm0, %v5399_v11  ;;  %v2581_v33 = vld [vmem:[%s7048_s12 + $0x100] sm:$0xff] }
 0xa9e   : > { %v2270_v56 = vpop.f32.mrb[22].mxu1 }
 0xa9f   : > { %v4863_v58 = vpop.f32.mrb[23].mxu1  ;;  %v2271_v59 = vadd.f32 %v4298_v57, %v2270_v56  ;;  %v2586_v56 = vld [vmem:[%s7048_s12 + $0x128] sm:$0xff] }
 0xaa0   : > { %v2602_v57 = vld [vmem:[%s7048_s12 + $0x1a8] sm:$0xff]  ;;  %v2588_v58 = vld [vmem:[%s7048_s12 + $0x138] sm:$0xff] }
 0xb62   : > { %v2020_v34 = vpop.f32.mrb[14].mxu0 }
 0xb63   : > { %v2024_v35 = vadd.f32 %v2020_v34, %v5763_v51  ;;  %v4830_v36 = vpop.f32.mrb[15].mxu0  ;;  %v2597_v34 = vld [vmem:[%s7048_s12 + $0x180] sm:$0xff] }
 0xb64   : > { %v4957_v36 = vpack.c.bf16 %v2597_v34, %v2581_v33  ;;  %v2578_v33 = vld [vmem:[%s7048_s12 + $0xe8] sm:$0xff]  ;;  %v2564_v34 = vld [vmem:[%s7048_s12 + $0x78] sm:$0xff] }
 0xb6a   : > { %v2187_v39 = vpop.f32.mrb[16].mxu0 }
 0xb6b   : > { %v2188_v40 = vadd.f32 %v4291_v37, %v2187_v39  ;;  %v4852_v41 = vpop.f32.mrb[17].mxu0  ;;  %v2583_v37 = vld [vmem:[%s7048_s12 + $0x110] sm:$0xff] }
 0xb6c   : > { %v4965_v39 = vpack.c.bf16 %v2599_v38, %v2583_v37  ;;  %v2570_v41 = vld [vmem:[%s7048_s12 + $0xa8] sm:$0xff]  ;;  %v2561_v38 = vld [vmem:[%s7048_s12 + $0x60] sm:$0xff] }
 0xb6d   : > { %4865 = vmatpush3.xpose.msk.msra.mxu0 %vm821_vm2, %v2188_v40  ;;  %v2554_v40 = vld [vmem:[%s7048_s12 + $0x28] sm:$0xff] }
 0xb6e   : > { %4869 = vmatprep.subr.mxu0 %v5399_v11  ;;  %v4967_v43 = vpack.c.bf16 %v2570_v41, %v2554_v40 }
 0xb70   : > { %4867 = vmatmul.mubr.msk.f32.vlgmr.msra.gmra.mrb[18].mxu0 %vm821_vm2, %v2105_v42  ;;  %v2556_v42 = vld [vmem:[%s7048_s12 + $0x38] sm:$0xff] }
 0xb71   : > { %4871 = vmatprep.mubr.msk.f32.mxu0 %vm5398_vm0, %v5399_v11  ;;  %4870 = vmatpush3.msra.mxu0 %v2271_v59  ;;  %v4975_v45 = vpack.c.bf16 %v2572_v44, %v2556_v42  ;;  %v2604_v59 = vld [vmem:[%s7048_s12 + $0x1b8] sm:$0xff]  ;;  %v2563_v42 = vld [vmem:[%s7048_s12 + $0x70] sm:$0xff]  ;;  %v2594_v44 = vld [vmem:[%s7048_s12 + $0x168] sm:$0xff] }
 0xb72   : > { %4952 = vmatprep.subr.bf16.mxu0 %v4951_v19  ;;  %v2575_v19 = vld [vmem:[%s7048_s12 + $0xd0] sm:$0xff] }
 0xc43   : > { %v2346_v49 = vpop.f32.mrb[18].mxu0 }
 0xc44   : > { %v4868_v50 = vpop.f32.mrb[19].mxu0  ;;  %v2350_v51 = vsel %vm821_vm2, %v2346_v49, -inf }
 0xc45   : > { %2351 = vmax.xlane.f32.xlu0 %v2350_v51  ;;  %v4307_v51 = vld [vmem:[%s7047_s11] ss:$0 sm:$0xff] }
 0xcd2   : > { %v2352_v52 = vpop.xlane.xlu0 %2351 }
 0xcd3   : > { %v2353_v53 = vsub.f32 %v2346_v49, %v2352_v52  ;;  %v4306_v49 = vld [vmem:[%s7046_s10] ss:$0 sm:$0xff] }
 0xcd4   : > { %v2553_v52 = vld [vmem:[%s7048_s12 + $0x20] sm:$0xff] }
 0xcd5   : > { %v2354_v54 = vmul.f32 1.442695, %v2353_v53  ;;  %v2569_v53 = vld [vmem:[%s7048_s12 + $0xa0] sm:$0xff] }
 0xcd7   : > { %5325 = vpow2.f32 %v2354_v54 }
 0xce1   : > { %v5326_v55 = vpop.eup %5325 }
 0xce2   : > { %v2356_v3 = vsel %vm821_vm2, %v5326_v55, 0.0 }
 0xce3   : > { %2357 = vadd.xlane.f32.xlu1 %v2356_v3  ;;  %v2571_v3 = vld [vmem:[%s7048_s12 + $0xb0] sm:$0xff] }
 0xd70   : > { %v2358_v61 = vpop.xlane.xlu1 %2357 }
 0xd71   : > { %5327 = vrcp.f32 %v2358_v61  ;;  %v4969_v61 = vpack.c.bf16 %v2569_v53, %v2553_v52 }
 0xd7b   : > { %v5328_v62 = vpop.eup %5327 }
 0xd7c   : > { %v2360_v63 = vmul.f32 %v5328_v62, %v5326_v55  ;;  %v2555_v55 = vld [vmem:[%s7048_s12 + $0x30] sm:$0xff] }
 0xd7d   : > { %v4977_v62 = vpack.c.bf16 %v2571_v3, %v2555_v55  ;;  %v2611_v55 = vld [vmem:[%s7048_s12 + $0x1f0] sm:$0xff]  ;;  %v3300_v3 = vld [vmem:[%s7050_s14 + $0x80] sm:$0xff] }
 0xd7e   : > { %4872 = vmatmul.mubr.msk.f32.vlgmr.msra.gmra.mrb[20].mxu0 %vm821_vm2, %v2360_v63  ;;  %v2585_v63 = vld [vmem:[%s7048_s12 + $0x120] sm:$0xff] }
 0xd7f   : > { %2764 = vmatprep.mubr.f32.mxu0 %v5399_v11  ;;  %4954 = vmatpush1.bf16.msra.mxu0 %v4953_v24 }
 0xd80   : > { %4956 = vmatprep.subr.bf16.mxu0 %v4955_v31  ;;  %v2607_v31 = vld [vmem:[%s7048_s12 + $0x1d0] sm:$0xff] }
 0xd83   : > { %4958 = vmatpush1.bf16.msra.mxu0 %v4957_v36 }
 0xd84   : > { %4968 = vmatprep.subr.bf16.mxu0 %v4967_v43  ;;  %v2579_v43 = vld [vmem:[%s7048_s12 + $0xf0] sm:$0xff] }
 0xe51   : > { %v2430_v0 = vpop.f32.mrb[20].mxu0 }
 0xe52   : > { %v4873_v1 = vpop.f32.mrb[21].mxu0  ;;  %4877 = vmatmul.mubr.msk.f32.vlgmr.msra.gmra.mrb[24].mxu1 %vm821_vm2, %v2430_v0  ;;  %v2601_v0 = vld [vmem:[%s7048_s12 + $0x1a0] sm:$0xff] }
 0xe53   : > { %2835 = vmatprep.mubr.f32.mxu1 %v5399_v11 }
 0xf25   : > { %v2505_v2 = vpop.f32.mrb[24].mxu1 }
 0xf26   : > { %v2509_v5 = vadd.f32 %v2505_v2, %v2024_v35  ;;  %v4878_v6 = vpop.f32.mrb[25].mxu1  ;;  %v4963_v35 = vpack.c.bf16 %v2600_v32, %v2584_v30  ;;  %v4971_v2 = vpack.c.bf16 %v2602_v57, %v2586_v56  ;;  %v2591_v30 = vld [vmem:[%s7048_s12 + $0x150] sm:$0xff]  ;;  %v2562_v32 = vld [vmem:[%s7048_s12 + $0x68] sm:$0xff]  ;;  %v3332_v57 = vld [vmem:[%s7050_s14 + $0x180] sm:$0xff] }
 0xf27   : > { %v2603_v6 = vld [vmem:[%s7048_s12 + $0x1b0] sm:$0xff]  ;;  %v4997_v37 = vpack.c.bf16 %v2607_v31, %v2591_v30  ;;  %v4999_v40 = vpack.c.bf16 %v2578_v33, %v2562_v32  ;;  %v3301_v56 = vld [vmem:[%s7050_s14 + $0x88] sm:$0xff]  ;;  %v3307_v30 = vld [vmem:[%s7050_s14 + $0xb8] sm:$0xff] }
 0xf28   : > { %v2517_v7 = vadd.f32 %v4305_v4, %v2509_v5  ;;  %v4979_v4 = vpack.c.bf16 %v2604_v59, %v2588_v58  ;;  %v2587_v5 = vld [vmem:[%s7048_s12 + $0x130] sm:$0xff]  ;;  %v3333_v58 = vld [vmem:[%s7050_s14 + $0x188] sm:$0xff]  ;;  %v3339_v32 = vld [vmem:[%s7050_s14 + $0x1b8] sm:$0xff] }
 0xf29   : > { %v3338_v31 = vld [vmem:[%s7050_s14 + $0x1b0] sm:$0xff] }
 0xf2a   : > { %v2518_v8 = vadd.f32 %v2517_v7, %v5584_v16  ;;  %v2552_v16 = vld [vmem:[%s7048_s12 + $0x18] sm:$0xff]  ;;  %v2558_v7 = vld [vmem:[%s7048_s12 + $0x48] sm:$0xff] }
 0xf2b   : > { %v4959_v23 = vpack.c.bf16 %v2568_v20, %v2552_v16  ;;  %v2559_v16 = vld [vmem:[%s7048_s12 + $0x50] sm:$0xff]  ;;  %v2590_v20 = vld [vmem:[%s7048_s12 + $0x148] sm:$0xff] }
 0xf2c   : > { %v2521_v9 = vsel %vm585_vm1, %v2518_v8, 0.0  ;;  %v4993_v25 = vpack.c.bf16 %v2575_v19, %v2559_v16  ;;  %v4987_v28 = vpack.c.bf16 %v2606_v21, %v2590_v20  ;;  %v3305_v16 = vld [vmem:[%s7050_s14 + $0xa8] sm:$0xff]  ;;  %v3336_v19 = vld [vmem:[%s7050_s14 + $0x1a0] sm:$0xff] }
 0xf2d   : > { %2522 = vadd.xlane.f32.xlu0 %v2521_v9  ;;  %4960 = vmatprep.subr.bf16.mxu1 %v4959_v23  ;;  %v2560_v9 = vld [vmem:[%s7048_s12 + $0x58] sm:$0xff]  ;;  %v3337_v20 = vld [vmem:[%s7050_s14 + $0x1a8] sm:$0xff] }
 0xf2e   : > { %4962 = vmatpush1.bf16.msra.mxu1 %v4961_v27  ;;  %v2608_v23 = vld [vmem:[%s7048_s12 + $0x1d8] sm:$0xff]  ;;  %v2605_v27 = vld [vmem:[%s7048_s12 + $0x1c0] sm:$0xff] }
 0xf2f   : > { %4964 = vmatprep.subr.bf16.mxu1 %v4963_v35  ;;  %v4995_v29 = vpack.c.bf16 %v2608_v23, %v2592_v22  ;;  %v2580_v35 = vld [vmem:[%s7048_s12 + $0xf8] sm:$0xff]  ;;  %v4989_v36 = vpack.c.bf16 %v2605_v27, %v2589_v26  ;;  %v3288_v23 = vld [vmem:[%s7050_s14 + $0x20] sm:$0xff]  ;;  %v5055_v26 = vpack.c.bf16 %v3337_v20, %v3336_v19 }
 0xf30   : > { %v5007_v41 = vpack.c.bf16 %v2580_v35, %v2564_v34  ;;  %v3320_v27 = vld [vmem:[%s7050_s14 + $0x120] sm:$0xff]  ;;  %v3290_v35 = vld [vmem:[%s7050_s14 + $0x30] sm:$0xff]  ;;  %v3347_v20 = vld [vmem:[%s7050_s14 + $0x1f8] sm:$0xff] }
 0xf32   : > { %4966 = vmatpush1.bf16.msra.mxu1 %v4965_v39  ;;  %v2577_v39 = vld [vmem:[%s7048_s12 + $0xe0] sm:$0xff] }
 0xf33   : > { %4976 = vmatprep.subr.bf16.mxu1 %v4975_v45  ;;  %v2610_v45 = vld [vmem:[%s7048_s12 + $0x1e8] sm:$0xff] }
 0xf34   : > { %v5003_v52 = vpack.c.bf16 %v2610_v45, %v2594_v44  ;;  %v3341_v44 = vld [vmem:[%s7050_s14 + $0x1c8] sm:$0xff] }
 0xfba   : > { %v2523_v10 = vpop.xlane.xlu0 %2522 }
 0xfbb   : > { %v2525_v12 = vmul.f32 0.03125, %v2523_v10  ;;  %v2576_v10 = vld [vmem:[%s7048_s12 + $0xd8] sm:$0xff] }
 0xfbc   : > { %v4991_v18 = vpack.c.bf16 %v2576_v10, %v2560_v9 }
 0xfbd   : > { %v2526_v13 = vsub.f32 %v2518_v8, %v2525_v12  ;;  %v2574_v8 = vld [vmem:[%s7048_s12 + $0xc8] sm:$0xff]  ;;  %v4973_v12 = vpack.c.bf16 %v2601_v0, %v2585_v63  ;;  %v5015_v63 = vpack.c.bf16 %v3301_v56, %v3300_v3  ;;  %v5047_v0 = vpack.c.bf16 %v3333_v58, %v3332_v57  ;;  %v3343_v3 = vld [vmem:[%s7050_s14 + $0x1d8] sm:$0xff]  ;;  %v3294_v58 = vld [vmem:[%s7050_s14 + $0x50] sm:$0xff] }
 0xfbe   : > { %v4983_v17 = vpack.c.bf16 %v2574_v8, %v2558_v7  ;;  %v3334_v7 = vld [vmem:[%s7050_s14 + $0x190] sm:$0xff]  ;;  %v3335_v8 = vld [vmem:[%s7050_s14 + $0x198] sm:$0xff] }
 0xfbf   : > { %v2527_v14 = vmul.f32 %v2526_v13, %v2526_v13 }
 0xfc1   : > { %v2528_v15 = vsel %vm585_vm1, %v2527_v14, 0.0  ;;  %v2557_v14 = vld [vmem:[%s7048_s12 + $0x40] sm:$0xff] }
 0xfc2   : > { %2529 = vadd.xlane.f32.xlu1 %v2528_v15  ;;  %v2573_v15 = vld [vmem:[%s7048_s12 + $0xc0] sm:$0xff] }
 0xfc3   : > { %v4985_v24 = vpack.c.bf16 %v2573_v15, %v2557_v14  ;;  %v5051_v14 = vpack.c.bf16 %v3335_v8, %v3334_v7  ;;  %v3318_v15 = vld [vmem:[%s7050_s14 + $0x110] sm:$0xff]  ;;  %v3296_v8 = vld [vmem:[%s7050_s14 + $0x60] sm:$0xff] }
0x104f   : > { %v2530_v46 = vpop.xlane.xlu1 %2529 }
0x1050   : > { %v2531_v47 = vmul.f32 0.03125, %v2530_v46  ;;  %v2596_v46 = vld [vmem:[%s7048_s12 + $0x178] sm:$0xff] }
0x1052   : > { %v2532_v48 = vadd.f32 1e-05, %v2531_v47  ;;  %v2612_v47 = vld [vmem:[%s7048_s12 + $0x1f8] sm:$0xff] }
0x1053   : > { %v5011_v53 = vpack.c.bf16 %v2612_v47, %v2596_v46  ;;  %v3292_v47 = vld [vmem:[%s7050_s14 + $0x40] sm:$0xff] }
0x1054   : > { %5329 = vrsqrt.f32 %v2532_v48  ;;  %v5001_v48 = vpack.c.bf16 %v2577_v39, %v2561_v38  ;;  %v5059_v38 = vpack.c.bf16 %v3339_v32, %v3338_v31  ;;  %v3322_v39 = vld [vmem:[%s7050_s14 + $0x130] sm:$0xff]  ;;  %v3397_v32 = vld [vmem:[%s7050_s14 + $0x388] sm:$0xff] }
0x105e   : > { %v5330_v50 = vpop.eup %5329 }
0x105f   : > { %v2534_v54 = vmul.f32 %v5330_v50, %v2526_v13  ;;  %v4981_v13 = vpack.c.bf16 %v2603_v6, %v2587_v5  ;;  %v2593_v50 = vld [vmem:[%s7048_s12 + $0x160] sm:$0xff]  ;;  %v3302_v5 = vld [vmem:[%s7050_s14 + $0x90] sm:$0xff]  ;;  %v3303_v6 = vld [vmem:[%s7050_s14 + $0x98] sm:$0xff] }
0x1061   : > { %v2541_v60 = vmul.f32 %v4306_v49, %v2534_v54  ;;  %v5009_v49 = vpack.c.bf16 %v2579_v43, %v2563_v42  ;;  %v2595_v54 = vld [vmem:[%s7048_s12 + $0x170] sm:$0xff]  ;;  %v3309_v42 = vld [vmem:[%s7050_s14 + $0xc8] sm:$0xff]  ;;  %v3340_v43 = vld [vmem:[%s7050_s14 + $0x1c0] sm:$0xff] }
0x1063   : > { %v5985_v1 = vadd.f32 %v4307_v51, %v2541_v60  ;;  %v2609_v51 = vld [vmem:[%s7048_s12 + $0x1e0] sm:$0xff]  ;;  %v5013_v60 = vpack.c.bf16 %v2611_v55, %v2595_v54  ;;  %v3311_v54 = vld [vmem:[%s7050_s14 + $0xd8] sm:$0xff]  ;;  %v3342_v55 = vld [vmem:[%s7050_s14 + $0x1d0] sm:$0xff] }
0x1064   : > { %v5005_v59 = vpack.c.bf16 %v2609_v51, %v2593_v50  ;;  %v5063_v50 = vpack.c.bf16 %v3341_v44, %v3340_v43  ;;  %v3324_v51 = vld [vmem:[%s7050_s14 + $0x140] sm:$0xff] }
0x1065   : > { %4308 = vmatmul.mubr.msk.f32.vlgmr.msra.gmra.mrb[22].mxu0 %vm585_vm1, %v5985_v1  ;;  %4309 = vmatmul.mubr.msk.f32.vlgmr.msra.gmra.mrb[26].mxu1 %vm585_vm1, %v5985_v1 }
0x1066   : > { %4970 = vmatpush1.bf16.msra.mxu0 %v4969_v61  ;;  %4978 = vmatpush1.bf16.msra.mxu1 %v4977_v62  ;;  %v3284_v61 = vld [vmem:[%s7050_s14] sm:$0xff]  ;;  %v3285_v62 = vld [vmem:[%s7050_s14 + $0x8] sm:$0xff] }
0x1067   : > { %4972 = vmatprep.subr.bf16.mxu0 %v4971_v2  ;;  %4980 = vmatprep.subr.bf16.mxu1 %v4979_v4  ;;  %v3316_v2 = vld [vmem:[%s7050_s14 + $0x100] sm:$0xff]  ;;  %v3317_v4 = vld [vmem:[%s7050_s14 + $0x108] sm:$0xff]  ;;  %v5017_v9 = vpack.c.bf16 %v3285_v62, %v3284_v61  ;;  %v5067_v61 = vpack.c.bf16 %v3343_v3, %v3342_v55  ;;  %v3326_v62 = vld [vmem:[%s7050_s14 + $0x150] sm:$0xff] }
0x1068   : > { %2906 = vmatprep.mubr.f32.mxu0 %v5399_v11  ;;  %2977 = vmatprep.mubr.f32.mxu1 %v5399_v11  ;;  %v5049_v10 = vpack.c.bf16 %v3317_v4, %v3316_v2  ;;  %v3313_v2 = vld [vmem:[%s7050_s14 + $0xe8] sm:$0xff]  ;;  %v3344_v4 = vld [vmem:[%s7050_s14 + $0x1e0] sm:$0xff] }
0x1069   : > { %v3380_v3 = vld [vmem:[%s7050_s14 + $0x300] sm:$0xff] }
0x106a   : > { %4974 = vmatpush1.bf16.msra.mxu0 %v4973_v12  ;;  %4982 = vmatpush1.bf16.msra.mxu1 %v4981_v13  ;;  %v3287_v12 = vld [vmem:[%s7050_s14 + $0x18] sm:$0xff]  ;;  %v5019_v13 = vpack.c.bf16 %v3303_v6, %v3302_v5  ;;  %v3345_v5 = vld [vmem:[%s7050_s14 + $0x1e8] sm:$0xff] }
0x106b   : > { %4984 = vmatprep.subr.bf16.mxu0 %v4983_v17  ;;  %4992 = vmatprep.subr.bf16.mxu1 %v4991_v18  ;;  %v3319_v17 = vld [vmem:[%s7050_s14 + $0x118] sm:$0xff]  ;;  %v3304_v18 = vld [vmem:[%s7050_s14 + $0xa0] sm:$0xff] }
0x106c   : > { %v5053_v22 = vpack.c.bf16 %v3319_v17, %v3318_v15  ;;  %v3314_v17 = vld [vmem:[%s7050_s14 + $0xf0] sm:$0xff] }
0x106d   : > { %4310 = vmatmul.mubr.msk.f32.vlgmr.msra.gmra.mrb[24].mxu0 %vm585_vm1, %v5985_v1  ;;  %4311 = vmatmul.mubr.msk.f32.vlgmr.msra.gmra.mrb[28].mxu1 %vm585_vm1, %v5985_v1 }
0x106e   : > { %4986 = vmatpush1.bf16.msra.mxu0 %v4985_v24  ;;  %4994 = vmatpush1.bf16.msra.mxu1 %v4993_v25  ;;  %v3289_v24 = vld [vmem:[%s7050_s14 + $0x28] sm:$0xff]  ;;  %v5023_v25 = vpack.c.bf16 %v3305_v16, %v3304_v18  ;;  %v3315_v18 = vld [vmem:[%s7050_s14 + $0xf8] sm:$0xff]  ;;  %v3346_v16 = vld [vmem:[%s7050_s14 + $0x1f0] sm:$0xff] }
0x106f   : > { %4988 = vmatprep.subr.bf16.mxu0 %v4987_v28  ;;  %4996 = vmatprep.subr.bf16.mxu1 %v4995_v29  ;;  %v3321_v28 = vld [vmem:[%s7050_s14 + $0x128] sm:$0xff]  ;;  %v3306_v29 = vld [vmem:[%s7050_s14 + $0xb0] sm:$0xff]  ;;  %v5025_v33 = vpack.c.bf16 %v3289_v24, %v3288_v23  ;;  %v5043_v19 = vpack.c.bf16 %v3315_v18, %v3314_v17  ;;  %v5075_v23 = vpack.c.bf16 %v3347_v20, %v3346_v16 }
0x1070   : > { %3048 = vmatprep.mubr.f32.mxu0 %v5399_v11  ;;  %3119 = vmatprep.mubr.f32.mxu1 %v5399_v11  ;;  %v5057_v34 = vpack.c.bf16 %v3321_v28, %v3320_v27  ;;  %v3364_v28 = vld [vmem:[%s7050_s14 + $0x280] sm:$0xff]  ;;  %v3369_v16 = vld [vmem:[%s7050_s14 + $0x2a8] sm:$0xff] }
0x1071   : > { %v3401_v20 = vld [vmem:[%s7050_s14 + $0x3a8] sm:$0xff] }
0x1072   : > { %4990 = vmatpush1.bf16.msra.mxu0 %v4989_v36  ;;  %4998 = vmatpush1.bf16.msra.mxu1 %v4997_v37  ;;  %v3291_v36 = vld [vmem:[%s7050_s14 + $0x38] sm:$0xff]  ;;  %v5027_v37 = vpack.c.bf16 %v3307_v30, %v3306_v29  ;;  %v3365_v29 = vld [vmem:[%s7050_s14 + $0x288] sm:$0xff]  ;;  %v3396_v30 = vld [vmem:[%s7050_s14 + $0x380] sm:$0xff] }
0x1073   : > { %5000 = vmatprep.subr.bf16.mxu0 %v4999_v40  ;;  %5008 = vmatprep.subr.bf16.mxu1 %v5007_v41  ;;  %v3323_v40 = vld [vmem:[%s7050_s14 + $0x138] sm:$0xff]  ;;  %v3308_v41 = vld [vmem:[%s7050_s14 + $0xc0] sm:$0xff]  ;;  %v5029_v45 = vpack.c.bf16 %v3291_v36, %v3290_v35  ;;  %v5079_v31 = vpack.c.bf16 %v3365_v29, %v3364_v28 }
0x1074   : > { %v5061_v46 = vpack.c.bf16 %v3323_v40, %v3322_v39 }
0x1075   : > { %4312 = vmatmul.mubr.msk.f32.vlgmr.msra.gmra.mrb[26].mxu0 %vm585_vm1, %v5985_v1  ;;  %4313 = vmatmul.mubr.msk.f32.vlgmr.msra.gmra.mrb[30].mxu1 %vm585_vm1, %v5985_v1 }
0x1076   : > { %5002 = vmatpush1.bf16.msra.mxu0 %v5001_v48  ;;  %5010 = vmatpush1.bf16.msra.mxu1 %v5009_v49  ;;  %v3293_v48 = vld [vmem:[%s7050_s14 + $0x48] sm:$0xff]  ;;  %v5031_v49 = vpack.c.bf16 %v3309_v42, %v3308_v41  ;;  %v6333_v41 = vld [vmem:[%s7049_s13] sm:$0xff] }
0x1077   : > { %5004 = vmatprep.subr.bf16.mxu0 %v5003_v52  ;;  %5012 = vmatprep.subr.bf16.mxu1 %v5011_v53  ;;  %v3325_v52 = vld [vmem:[%s7050_s14 + $0x148] sm:$0xff]  ;;  %v3310_v53 = vld [vmem:[%s7050_s14 + $0xd0] sm:$0xff]  ;;  %v5033_v56 = vpack.c.bf16 %v3293_v48, %v3292_v47 }
0x1078   : > { %3190 = vmatprep.mubr.f32.mxu0 %v5399_v11  ;;  %3261 = vmatprep.mubr.f32.mxu1 %v5399_v11  ;;  %v3286_v11 = vld [vmem:[%s7050_s14 + $0x10] sm:$0xff]  ;;  %v5065_v57 = vpack.c.bf16 %v3325_v52, %v3324_v51  ;;  %v3349_v51 = vld [vmem:[%s7050_s14 + $0x208] sm:$0xff] }
0x1079   : > { %v5021_v21 = vpack.c.bf16 %v3287_v12, %v3286_v11  ;;  %v3297_v11 = vld [vmem:[%s7050_s14 + $0x68] sm:$0xff]  ;;  %v3328_v12 = vld [vmem:[%s7050_s14 + $0x160] sm:$0xff] }
0x107a   : > { %5006 = vmatpush1.bf16.msra.mxu0 %v5005_v59  ;;  %5014 = vmatpush1.bf16.msra.mxu1 %v5013_v60  ;;  %v3295_v59 = vld [vmem:[%s7050_s14 + $0x58] sm:$0xff]  ;;  %v5035_v60 = vpack.c.bf16 %v3311_v54, %v3310_v53 }
0x107b   : > { %5016 = vmatprep.subr.bf16.mxu0 %v5015_v63  ;;  %5048 = vmatprep.subr.bf16.mxu1 %v5047_v0  ;;  %v3327_v63 = vld [vmem:[%s7050_s14 + $0x158] sm:$0xff]  ;;  %v3312_v0 = vld [vmem:[%s7050_s14 + $0xe0] sm:$0xff]  ;;  %v5037_v6 = vpack.c.bf16 %v3295_v59, %v3294_v58 }
0x107c   : > { %v5069_v7 = vpack.c.bf16 %v3327_v63, %v3326_v62  ;;  %v3367_v62 = vld [vmem:[%s7050_s14 + $0x298] sm:$0xff]  ;;  %v3398_v63 = vld [vmem:[%s7050_s14 + $0x390] sm:$0xff] }
0x107d   : > { %4314 = vmatmul.mubr.msk.f32.vlgmr.msra.gmra.mrb[28].mxu0 %vm585_vm1, %v5985_v1  ;;  %4315 = vmatmul.mubr.msk.f32.vlgmr.msra.gmra.mrb[32].mxu1 %vm585_vm1, %v5985_v1 }
0x107e   : > { %5018 = vmatpush3.bf16.msra.mxu0 %v5017_v9  ;;  %5050 = vmatpush3.bf16.msra.mxu1 %v5049_v10  ;;  %v5039_v9 = vpack.c.bf16 %v3313_v2, %v3312_v0  ;;  %v5071_v10 = vpack.c.bf16 %v3345_v5, %v3344_v4  ;;  %v3399_v0 = vld [vmem:[%s7050_s14 + $0x398] sm:$0xff] }
0x107f   : > { %5020 = vmatprep.subr.bf16.mxu0 %v5019_v13  ;;  %5052 = vmatprep.subr.bf16.mxu1 %v5051_v14  ;;  %v3329_v13 = vld [vmem:[%s7050_s14 + $0x168] sm:$0xff]  ;;  %v5041_v14 = vpack.c.bf16 %v3297_v11, %v3296_v8  ;;  %v3351_v8 = vld [vmem:[%s7050_s14 + $0x218] sm:$0xff] }
0x1080   : > { %v5073_v15 = vpack.c.bf16 %v3329_v13, %v3328_v12  ;;  %v5115_v12 = vpack.c.bf16 %v3399_v0, %v3398_v63  ;;  %v3382_v13 = vld [vmem:[%s7050_s14 + $0x310] sm:$0xff] }
0x1082   : > { %5022 = vmatpush3.bf16.msra.mxu0 %v5021_v21  ;;  %5054 = vmatpush3.bf16.msra.mxu1 %v5053_v22  ;;  %v3298_v21 = vld [vmem:[%s7050_s14 + $0x70] sm:$0xff]  ;;  %v3299_v22 = vld [vmem:[%s7050_s14 + $0x78] sm:$0xff] }
0x1083   : > { %5024 = vmatprep.subr.bf16.mxu0 %v5023_v25  ;;  %5056 = vmatprep.subr.bf16.mxu1 %v5055_v26  ;;  %v5045_v24 = vpack.c.bf16 %v3299_v22, %v3298_v21  ;;  %v3330_v25 = vld [vmem:[%s7050_s14 + $0x170] sm:$0xff]  ;;  %v3331_v26 = vld [vmem:[%s7050_s14 + $0x178] sm:$0xff] }
0x1084   : > { %v5077_v27 = vpack.c.bf16 %v3331_v26, %v3330_v25  ;;  %v3352_v25 = vld [vmem:[%s7050_s14 + $0x220] sm:$0xff]  ;;  %v3353_v26 = vld [vmem:[%s7050_s14 + $0x228] sm:$0xff] }
0x1086   : > { %5026 = vmatpush3.bf16.msra.mxu0 %v5025_v33  ;;  %5058 = vmatpush3.bf16.msra.mxu1 %v5057_v34  ;;  %v5111_v33 = vpack.c.bf16 %v3397_v32, %v3396_v30  ;;  %v2617_v34 = vlaneseq  ;;  %v3385_v32 = vld [vmem:[%s7050_s14 + $0x328] sm:$0xff] }
0x1087   : > { %5028 = vmatprep.subr.bf16.mxu0 %v5027_v37  ;;  %5060 = vmatprep.subr.bf16.mxu1 %v5059_v38  ;;  %v6321_v37 = vld [vmem:[%s7049_s13 + $0x8] sm:$0xff] }
0x1088   : > { %v6315_v35 = vshrl.u32 %v2617_v34, 7 }
0x108a   : > { %5030 = vmatpush3.bf16.msra.mxu0 %v5029_v45  ;;  %5062 = vmatpush3.bf16.msra.mxu1 %v5061_v46  ;;  %v2643_v36 = vsub.s32 6, %v6315_v35  ;;  %v2619_v39 = vsub.s32 0, %v6315_v35  ;;  %v2627_v40 = vsub.s32 2, %v6315_v35  ;;  %v2623_v42 = vsub.s32 1, %v6315_v35 }
0x108b   : > { %5032 = vmatprep.subr.bf16.mxu0 %v5031_v49  ;;  %5064 = vmatprep.subr.bf16.mxu1 %v5063_v50  ;;  %v2631_v43 = vsub.s32 3, %v6315_v35  ;;  %v3348_v50 = vld [vmem:[%s7050_s14 + $0x200] sm:$0xff] }
0x108c   : > { %v6326_v38 = vrot.slane %v6321_v37, %v2643_v36  ;;  %v2620_v44 = vrot.slane %v6333_v41, %v2619_v39  ;;  %v2628_v45 = vrot.slane %v6333_v41, %v2627_v40  ;;  %v2624_v46 = vrot.slane %v6333_v41, %v2623_v42 }
0x108d   : > { %v2632_v47 = vrot.slane %v6333_v41, %v2631_v43  ;;  %v5081_v5 = vpack.c.bf16 %v3349_v51, %v3348_v50  ;;  %v2652_v51 = vrot.slane %v6321_v37, %v2619_v39 }
0x108e   : > { %5034 = vmatpush3.bf16.msra.mxu0 %v5033_v56  ;;  %5066 = vmatpush3.bf16.msra.mxu1 %v5065_v57  ;;  %v3381_v56 = vld [vmem:[%s7050_s14 + $0x308] sm:$0xff]  ;;  %v3366_v57 = vld [vmem:[%s7050_s14 + $0x290] sm:$0xff] }
0x108f   : > { %5036 = vmatprep.subr.bf16.mxu0 %v5035_v60  ;;  %5068 = vmatprep.subr.bf16.mxu1 %v5067_v61  ;;  %v2639_v60 = vsub.s32 5, %v6315_v35  ;;  %v2647_v61 = vsub.s32 7, %v6315_v35  ;;  %v5083_v11 = vpack.c.bf16 %v3367_v62, %v3366_v57  ;;  %v3387_v57 = vld [vmem:[%s7050_s14 + $0x338] sm:$0xff]  ;;  %v3405_v62 = vld [vmem:[%s7050_s14 + $0x3c8] sm:$0xff] }
0x1091   : > { %v2640_v17 = vrot.slane %v6333_v41, %v2639_v60  ;;  %v2648_v18 = vrot.slane %v6333_v41, %v2647_v61 }
0x1092   : > { %5038 = vmatpush3.bf16.msra.mxu0 %v5037_v6  ;;  %5070 = vmatpush3.bf16.msra.mxu1 %v5069_v7  ;;  %v5113_v6 = vpack.c.bf16 %v3381_v56, %v3380_v3  ;;  %v3350_v7 = vld [vmem:[%s7050_s14 + $0x210] sm:$0xff]  ;;  %v2660_v3 = vrot.slane %v6321_v37, %v2627_v40  ;;  %v3404_v40 = vld [vmem:[%s7050_s14 + $0x3c0] sm:$0xff] }
0x1093   : > { %5040 = vmatprep.subr.bf16.mxu0 %v5039_v9  ;;  %5072 = vmatprep.subr.bf16.mxu1 %v5071_v10 }
0x1096   : > { %5042 = vmatpush3.bf16.msra.mxu0 %v5041_v14  ;;  %5074 = vmatpush3.bf16.msra.mxu1 %v5073_v15  ;;  %v3383_v14 = vld [vmem:[%s7050_s14 + $0x318] sm:$0xff]  ;;  %v3368_v15 = vld [vmem:[%s7050_s14 + $0x2a0] sm:$0xff] }
0x1097   : > { %5044 = vmatprep.subr.bf16.mxu0 %v5043_v19  ;;  %5076 = vmatprep.subr.bf16.mxu1 %v5075_v23  ;;  %v3400_v19 = vld [vmem:[%s7050_s14 + $0x3a0] sm:$0xff]  ;;  %v5085_v23 = vpack.c.bf16 %v3351_v8, %v3350_v7  ;;  %v5087_v29 = vpack.c.bf16 %v3369_v16, %v3368_v15  ;;  %v3357_v7 = vld [vmem:[%s7050_s14 + $0x248] sm:$0xff]  ;;  %v3374_v15 = vld [vmem:[%s7050_s14 + $0x2d0] sm:$0xff] }
0x1098   : > { %v5119_v30 = vpack.c.bf16 %v3401_v20, %v3400_v19  ;;  %v3407_v16 = vld [vmem:[%s7050_s14 + $0x3d8] sm:$0xff]  ;;  %v2635_v19 = vsub.s32 4, %v6315_v35  ;;  %v3508_v35 = vld [vmem:[%s7050_s14 + $0x700] sm:$0xff] }
0x109a   : > { %5046 = vmatpush3.bf16.msra.mxu0 %v5045_v24  ;;  %5078 = vmatpush3.bf16.msra.mxu1 %v5077_v27  ;;  %v5117_v24 = vpack.c.bf16 %v3383_v14, %v3382_v13  ;;  %v3388_v13 = vld [vmem:[%s7050_s14 + $0x340] sm:$0xff]  ;;  %v3389_v14 = vld [vmem:[%s7050_s14 + $0x348] sm:$0xff] }
0x109b   : > { %5080 = vmatprep.subr.bf16.mxu0 %v5079_v31  ;;  %5112 = vmatprep.subr.bf16.mxu1 %v5111_v33  ;;  %v3384_v31 = vld [vmem:[%s7050_s14 + $0x320] sm:$0xff]  ;;  %v3370_v33 = vld [vmem:[%s7050_s14 + $0x2b0] sm:$0xff] }
0x1138   : > { %v2766_v48 = vpop.f32.mrb[22].mxu0  ;;  %v2837_v49 = vpop.f32.mrb[26].mxu1 }
0x1139   : > { %v2767_v52 = vadd.f32 %v2766_v48, %v2620_v44  ;;  %v2838_v53 = vadd.f32 %v2837_v49, %v2628_v45  ;;  %v2768_v54 = vpop.f32.mrb[23].mxu0  ;;  %v2839_v55 = vpop.f32.mrb[27].mxu1  ;;  %v3371_v45 = vld [vmem:[%s7050_s14 + $0x2b8] sm:$0xff]  ;;  %v5089_v48 = vpack.c.bf16 %v3353_v26, %v3352_v25  ;;  %v3390_v26 = vld [vmem:[%s7050_s14 + $0x350] sm:$0xff] }
0x113a   : > { %v2769_v58 = vadd.f32 %v2768_v54, %v2624_v46  ;;  %v2840_v59 = vadd.f32 %v2839_v55, %v2632_v47  ;;  %v3402_v46 = vld [vmem:[%s7050_s14 + $0x3b0] sm:$0xff]  ;;  %v3403_v47 = vld [vmem:[%s7050_s14 + $0x3b8] sm:$0xff]  ;;  %v5091_v39 = vpack.c.bf16 %v3371_v45, %v3370_v33  ;;  %v3408_v33 = vld [vmem:[%s7050_s14 + $0x3e0] sm:$0xff] }
0x113b   : > { %v3268_v9 = vmax.f32 %v2767_v52, 0.0  ;;  %v3270_v10 = vmax.f32 %v2838_v53, 0.0  ;;  %v5121_v52 = vpack.c.bf16 %v3385_v32, %v3384_v31  ;;  %v3354_v53 = vld [vmem:[%s7050_s14 + $0x230] sm:$0xff]  ;;  %v3355_v54 = vld [vmem:[%s7050_s14 + $0x238] sm:$0xff]  ;;  %v5123_v56 = vpack.c.bf16 %v3403_v47, %v3402_v46  ;;  %v3376_v31 = vld [vmem:[%s7050_s14 + $0x2e0] sm:$0xff] }
0x113c   : > { %v3269_v2 = vmax.f32 %v2769_v58, 0.0  ;;  %v3271_v4 = vmax.f32 %v2840_v59, 0.0  ;;  %v3386_v55 = vld [vmem:[%s7050_s14 + $0x330] sm:$0xff]  ;;  %v3372_v58 = vld [vmem:[%s7050_s14 + $0x2c0] sm:$0xff]  ;;  %v3373_v59 = vld [vmem:[%s7050_s14 + $0x2c8] sm:$0xff] }
0x113d   : > { %v3359_v25 = vld [vmem:[%s7050_s14 + $0x258] sm:$0xff]  ;;  %v3377_v32 = vld [vmem:[%s7050_s14 + $0x2e8] sm:$0xff] }
0x113e   : > { %3611 = vmatprep.mubr.f32.mxu0 %v3269_v2  ;;  %3681 = vmatprep.mubr.f32.mxu1 %v3271_v4  ;;  %v5093_v2 = vpack.c.bf16 %v3355_v54, %v3354_v53  ;;  %v5125_v4 = vpack.c.bf16 %v3387_v57, %v3386_v55  ;;  %v3410_v57 = vld [vmem:[%s7050_s14 + $0x3f0] sm:$0xff] }
0x113f   : > { %3612 = vmatmul.mubr.f32.vlgmr.msra.gmra.mrb[30].mxu0 %v3268_v9  ;;  %3682 = vmatmul.mubr.f32.vlgmr.msra.gmra.mrb[34].mxu1 %v3270_v10 }
0x1140   : > { %v6405_v21 = vpop.f32.mrb[24].mxu0  ;;  %v6407_v22 = vpop.f32.mrb[28].mxu1  ;;  %5082 = vmatpush3.bf16.msra.mxu0 %v5081_v5  ;;  %5114 = vmatpush3.bf16.msra.mxu1 %v5113_v6  ;;  %v5095_v5 = vpack.c.bf16 %v3373_v59, %v3372_v58  ;;  %v3356_v6 = vld [vmem:[%s7050_s14 + $0x240] sm:$0xff]  ;;  %v3411_v58 = vld [vmem:[%s7050_s14 + $0x3f8] sm:$0xff]  ;;  %v2636_v59 = vrot.slane %v6333_v41, %v2635_v19 }
0x1141   : > { %v2910_v27 = vpop.f32.mrb[25].mxu0  ;;  %v2981_v28 = vpop.f32.mrb[29].mxu1  ;;  %5084 = vmatprep.subr.bf16.mxu0 %v5083_v11  ;;  %5116 = vmatprep.subr.bf16.mxu1 %v5115_v12  ;;  %v5127_v12 = vpack.c.bf16 %v3405_v62, %v3404_v40  ;;  %v5097_v20 = vpack.c.bf16 %v3357_v7, %v3356_v6  ;;  %v5139_v6 = vpack.c.bf16 %v3411_v58, %v3410_v57  ;;  %v3395_v7 = vld [vmem:[%s7050_s14 + $0x378] sm:$0xff]  ;;  %v3416_v57 = vld [vmem:[%s7050_s14 + $0x420] sm:$0xff]  ;;  %v3417_v58 = vld [vmem:[%s7050_s14 + $0x428] sm:$0xff] }
0x1142   : > { %v2911_v34 = vadd.f32 %v2910_v27, %v2640_v17  ;;  %v2982_v44 = vadd.f32 %v2981_v28, %v2648_v18  ;;  %v3375_v17 = vld [vmem:[%s7050_s14 + $0x2d8] sm:$0xff]  ;;  %v3406_v18 = vld [vmem:[%s7050_s14 + $0x3d0] sm:$0xff]  ;;  %v2668_v27 = vrot.slane %v6321_v37, %v2635_v19  ;;  %v2909_v19 = vadd.f32 %v6405_v21, %v2636_v59  ;;  %v3445_v21 = vld [vmem:[%s7050_s14 + $0x508] sm:$0xff] }
0x1143   : > { %v5099_v28 = vpack.c.bf16 %v3375_v17, %v3374_v15  ;;  %v2664_v15 = vrot.slane %v6321_v37, %v2631_v43  ;;  %v3413_v43 = vld [vmem:[%s7050_s14 + $0x408] sm:$0xff]  ;;  %v3448_v59 = vld [vmem:[%s7050_s14 + $0x520] sm:$0xff] }
0x1144   : > { %v3273_v49 = vmax.f32 %v2911_v34, 0.0  ;;  %v3275_v50 = vmax.f32 %v2982_v44, 0.0  ;;  %5086 = vmatpush3.bf16.msra.mxu0 %v5085_v23  ;;  %5118 = vmatpush3.bf16.msra.mxu1 %v5117_v24  ;;  %v5129_v23 = vpack.c.bf16 %v3389_v14, %v3388_v13  ;;  %v3358_v24 = vld [vmem:[%s7050_s14 + $0x250] sm:$0xff]  ;;  %v3409_v34 = vld [vmem:[%s7050_s14 + $0x3e8] sm:$0xff] }
0x1145   : > { %5088 = vmatprep.subr.bf16.mxu0 %v5087_v29  ;;  %5120 = vmatprep.subr.bf16.mxu1 %v5119_v30  ;;  %v5131_v29 = vpack.c.bf16 %v3407_v16, %v3406_v18  ;;  %v3391_v30 = vld [vmem:[%s7050_s14 + $0x358] sm:$0xff]  ;;  %v5101_v46 = vpack.c.bf16 %v3359_v25, %v3358_v24  ;;  %v5135_v55 = vpack.c.bf16 %v3409_v34, %v3408_v33  ;;  %v3429_v13 = vld [vmem:[%s7050_s14 + $0x488] sm:$0xff]  ;;  %v3444_v25 = vld [vmem:[%s7050_s14 + $0x500] sm:$0xff] }
0x1146   : > { %3751 = vmatprep.mubr.f32.mxu0 %v3273_v49  ;;  %3821 = vmatprep.mubr.f32.mxu1 %v3275_v50  ;;  %v5133_v47 = vpack.c.bf16 %v3391_v30, %v3390_v26  ;;  %v3360_v49 = vld [vmem:[%s7050_s14 + $0x260] sm:$0xff]  ;;  %v3361_v50 = vld [vmem:[%s7050_s14 + $0x268] sm:$0xff]  ;;  %v3272_v30 = vmax.f32 %v2909_v19, 0.0  ;;  %v3415_v33 = vld [vmem:[%s7050_s14 + $0x418] sm:$0xff] }
0x1147   : > { %v5105_v40 = vpack.c.bf16 %v3361_v50, %v3360_v49  ;;  %v3461_v14 = vld [vmem:[%s7050_s14 + $0x588] sm:$0xff]  ;;  %v3446_v34 = vld [vmem:[%s7050_s14 + $0x510] sm:$0xff] }
0x1148   : > { %v3050_v63 = vpop.f32.mrb[26].mxu0  ;;  %v3121_v0 = vpop.f32.mrb[30].mxu1  ;;  %5090 = vmatpush3.bf16.msra.mxu0 %v5089_v48  ;;  %5122 = vmatpush3.bf16.msra.mxu1 %v5121_v52  ;;  %v5103_v48 = vpack.c.bf16 %v3377_v32, %v3376_v31  ;;  %v3414_v32 = vld [vmem:[%s7050_s14 + $0x410] sm:$0xff]  ;;  %v3433_v49 = vld [vmem:[%s7050_s14 + $0x4a8] sm:$0xff] }
0x1149   : > { %v6469_v8 = vadd.f32 %v3050_v63, %v2652_v51  ;;  %v6471_v9 = vadd.f32 %v3121_v0, %v2660_v3  ;;  %v6473_v10 = vpop.f32.mrb[27].mxu0  ;;  %v6475_v11 = vpop.f32.mrb[31].mxu1  ;;  %5092 = vmatprep.subr.bf16.mxu0 %v5091_v39  ;;  %5124 = vmatprep.subr.bf16.mxu1 %v5123_v56  ;;  %v3392_v3 = vld [vmem:[%s7050_s14 + $0x360] sm:$0xff]  ;;  %v3393_v39 = vld [vmem:[%s7050_s14 + $0x368] sm:$0xff]  ;;  %v3379_v56 = vld [vmem:[%s7050_s14 + $0x2f8] sm:$0xff] }
0x114a   : > { %v5137_v62 = vpack.c.bf16 %v3393_v39, %v3392_v3  ;;  %v3362_v63 = vld [vmem:[%s7050_s14 + $0x270] sm:$0xff]  ;;  %v3363_v0 = vld [vmem:[%s7050_s14 + $0x278] sm:$0xff]  ;;  %v3124_v26 = vadd.f32 %v6475_v11, %v2664_v15  ;;  %v5177_v11 = vpack.c.bf16 %v3445_v21, %v3444_v25  ;;  %v3465_v3 = vld [vmem:[%s7050_s14 + $0x5a8] sm:$0xff]  ;;  %v5149_v39 = vpack.c.bf16 %v3415_v33, %v3414_v32 }
0x114b   : > { %v5109_v17 = vpack.c.bf16 %v3363_v0, %v3362_v63  ;;  %v3434_v63 = vld [vmem:[%s7050_s14 + $0x4b0] sm:$0xff]  ;;  %v3435_v0 = vld [vmem:[%s7050_s14 + $0x4b8] sm:$0xff]  ;;  %v3436_v15 = vld [vmem:[%s7050_s14 + $0x4c0] sm:$0xff] }
0x114c   : > { %5094 = vmatpush3.bf16.msra.mxu0 %v5093_v2  ;;  %5126 = vmatpush3.bf16.msra.mxu1 %v5125_v4  ;;  %v3394_v2 = vld [vmem:[%s7050_s14 + $0x370] sm:$0xff]  ;;  %v2644_v4 = vrot.slane %v6333_v41, %v2643_v36  ;;  %v2656_v36 = vrot.slane %v6321_v37, %v2623_v42  ;;  %v3460_v41 = vld [vmem:[%s7050_s14 + $0x580] sm:$0xff]  ;;  %v3279_v50 = vmax.f32 %v3124_v26, 0.0  ;;  %v3453_v21 = vld [vmem:[%s7050_s14 + $0x548] sm:$0xff] }
0x114d   : > { %5096 = vmatprep.subr.bf16.mxu0 %v5095_v5  ;;  %5128 = vmatprep.subr.bf16.mxu1 %v5127_v12  ;;  %v3428_v12 = vld [vmem:[%s7050_s14 + $0x480] sm:$0xff]  ;;  %v5141_v18 = vpack.c.bf16 %v3395_v7, %v3394_v2  ;;  %v3466_v2 = vld [vmem:[%s7050_s14 + $0x5b0] sm:$0xff]  ;;  %v5155_v7 = vpack.c.bf16 %v3435_v0, %v3434_v63  ;;  %v3439_v26 = vld [vmem:[%s7050_s14 + $0x4d8] sm:$0xff] }
0x114e   : > { %v5143_v16 = vpack.c.bf16 %v3429_v13, %v3428_v12  ;;  %v2980_v42 = vadd.f32 %v6407_v22, %v2644_v4  ;;  %v3053_v24 = vadd.f32 %v6473_v10, %v2656_v36  ;;  %v3430_v22 = vld [vmem:[%s7050_s14 + $0x490] sm:$0xff]  ;;  %v3467_v4 = vld [vmem:[%s7050_s14 + $0x5b8] sm:$0xff] }
0x114f   : > { %v3462_v10 = vld [vmem:[%s7050_s14 + $0x590] sm:$0xff]  ;;  %v3419_v13 = vld [vmem:[%s7050_s14 + $0x438] sm:$0xff] }
0x1150   : > { %v3192_v44 = vpop.f32.mrb[28].mxu0  ;;  %v3263_v45 = vpop.f32.mrb[32].mxu1  ;;  %5098 = vmatpush3.bf16.msra.mxu0 %v5097_v20  ;;  %5130 = vmatpush3.bf16.msra.mxu1 %v5129_v23  ;;  %v5175_v20 = vpack.c.bf16 %v3461_v14, %v3460_v41  ;;  %v3412_v23 = vld [vmem:[%s7050_s14 + $0x400] sm:$0xff]  ;;  %v3274_v31 = vmax.f32 %v2980_v42, 0.0  ;;  %v3418_v12 = vld [vmem:[%s7050_s14 + $0x430] sm:$0xff]  ;;  %v5187_v41 = vpack.c.bf16 %v3467_v4, %v3466_v2  ;;  %v3451_v14 = vld [vmem:[%s7050_s14 + $0x538] sm:$0xff] }
0x1151   : > { %v6527_v51 = vadd.f32 %v3192_v44, %v2668_v27  ;;  %v6530_v52 = vadd.f32 %v3263_v45, %v6326_v38  ;;  %v6532_v53 = vpop.f32.mrb[29].mxu0  ;;  %v6534_v54 = vpop.f32.mrb[33].mxu1  ;;  %5100 = vmatprep.subr.bf16.mxu0 %v5099_v28  ;;  %5132 = vmatprep.subr.bf16.mxu1 %v5131_v29  ;;  %v3378_v38 = vld [vmem:[%s7050_s14 + $0x2f0] sm:$0xff]  ;;  %v3431_v27 = vld [vmem:[%s7050_s14 + $0x498] sm:$0xff]  ;;  %v5145_v29 = vpack.c.bf16 %v3413_v43, %v3412_v23  ;;  %v3277_v44 = vmax.f32 %v3053_v24, 0.0  ;;  %v3420_v23 = vld [vmem:[%s7050_s14 + $0x440] sm:$0xff] }
0x1152   : > { %v5107_v5 = vpack.c.bf16 %v3379_v56, %v3378_v38  ;;  %v3463_v28 = vld [vmem:[%s7050_s14 + $0x598] sm:$0xff]  ;;  %v5147_v45 = vpack.c.bf16 %v3431_v27, %v3430_v22  ;;  %v3450_v36 = vld [vmem:[%s7050_s14 + $0x530] sm:$0xff]  ;;  %v5157_v19 = vpack.c.bf16 %v3419_v13, %v3418_v12  ;;  %v3421_v43 = vld [vmem:[%s7050_s14 + $0x448] sm:$0xff] }
0x1153   : > { %v5189_v42 = vpack.c.bf16 %v3451_v14, %v3450_v36  ;;  %v3452_v24 = vld [vmem:[%s7050_s14 + $0x540] sm:$0xff]  ;;  %v3438_v22 = vld [vmem:[%s7050_s14 + $0x4d0] sm:$0xff]  ;;  %v3427_v4 = vld [vmem:[%s7050_s14 + $0x478] sm:$0xff]  ;;  %v2672_v36 = vrot.slane %v6321_v37, %v2639_v60 }
0x1154   : > { %5102 = vmatpush3.bf16.msra.mxu0 %v5101_v46  ;;  %5134 = vmatpush3.bf16.msra.mxu1 %v5133_v47  ;;  %v5179_v46 = vpack.c.bf16 %v3463_v28, %v3462_v10  ;;  %v3447_v47 = vld [vmem:[%s7050_s14 + $0x518] sm:$0xff]  ;;  %v3470_v27 = vld [vmem:[%s7050_s14 + $0x5d0] sm:$0xff]  ;;  %v5161_v28 = vpack.c.bf16 %v3421_v43, %v3420_v23  ;;  %v3492_v12 = vld [vmem:[%s7050_s14 + $0x680] sm:$0xff] }
0x1155   : > { %5104 = vmatprep.subr.bf16.mxu0 %v5103_v48  ;;  %5136 = vmatprep.subr.bf16.mxu1 %v5135_v55  ;;  %v3432_v48 = vld [vmem:[%s7050_s14 + $0x4a0] sm:$0xff]  ;;  %v5181_v38 = vpack.c.bf16 %v3447_v47, %v3446_v34  ;;  %v3471_v10 = vld [vmem:[%s7050_s14 + $0x5d8] sm:$0xff]  ;;  %v3454_v32 = vld [vmem:[%s7050_s14 + $0x550] sm:$0xff] }
0x1156   : > { %v3464_v55 = vld [vmem:[%s7050_s14 + $0x5a0] sm:$0xff]  ;;  %v5151_v56 = vpack.c.bf16 %v3433_v49, %v3432_v48  ;;  %v5195_v33 = vpack.c.bf16 %v3471_v10, %v3470_v27  ;;  %v3455_v34 = vld [vmem:[%s7050_s14 + $0x558] sm:$0xff]  ;;  %v3473_v47 = vld [vmem:[%s7050_s14 + $0x5e8] sm:$0xff]  ;;  %v3278_v10 = vmax.f32 %v6471_v9, 0.0 }
0x1157   : > { %v5197_v49 = vpack.c.bf16 %v3455_v34, %v3454_v32  ;;  %v3426_v2 = vld [vmem:[%s7050_s14 + $0x470] sm:$0xff]  ;;  %v3493_v13 = vld [vmem:[%s7050_s14 + $0x688] sm:$0xff]  ;;  %v3476_v60 = vld [vmem:[%s7050_s14 + $0x600] sm:$0xff] }
0x1158   : > { %5106 = vmatpush3.bf16.msra.mxu0 %v5105_v40  ;;  %5138 = vmatpush3.bf16.msra.mxu1 %v5137_v62  ;;  %v5183_v40 = vpack.c.bf16 %v3465_v3, %v3464_v55  ;;  %v3449_v62 = vld [vmem:[%s7050_s14 + $0x528] sm:$0xff]  ;;  %v3424_v55 = vld [vmem:[%s7050_s14 + $0x460] sm:$0xff]  ;;  %v3495_v23 = vld [vmem:[%s7050_s14 + $0x698] sm:$0xff] }
0x1159   : > { %5108 = vmatprep.subr.bf16.mxu0 %v5107_v5  ;;  %5140 = vmatprep.subr.bf16.mxu1 %v5139_v6  ;;  %v5153_v5 = vpack.c.bf16 %v3417_v58, %v3416_v57  ;;  %v5185_v6 = vpack.c.bf16 %v3449_v62, %v3448_v59  ;;  %v3425_v3 = vld [vmem:[%s7050_s14 + $0x468] sm:$0xff]  ;;  %v3442_v57 = vld [vmem:[%s7050_s14 + $0x4f0] sm:$0xff]  ;;  %v3443_v58 = vld [vmem:[%s7050_s14 + $0x4f8] sm:$0xff] }
0x115a   : > { %v3474_v59 = vld [vmem:[%s7050_s14 + $0x5f0] sm:$0xff]  ;;  %v5169_v62 = vpack.c.bf16 %v3425_v3, %v3424_v55  ;;  %v5171_v0 = vpack.c.bf16 %v3443_v58, %v3442_v57  ;;  %v3525_v14 = vld [vmem:[%s7050_s14 + $0x788] sm:$0xff]  ;;  %v3528_v9 = vld [vmem:[%s7050_s14 + $0x7a0] sm:$0xff] }
0x115b   : > { %v3510_v27 = vld [vmem:[%s7050_s14 + $0x710] sm:$0xff]  ;;  %v3529_v32 = vld [vmem:[%s7050_s14 + $0x7a8] sm:$0xff]  ;;  %v3499_v3 = vld [vmem:[%s7050_s14 + $0x6b8] sm:$0xff] }
0x115c   : > { %5110 = vmatpush3.bf16.msra.mxu0 %v5109_v17  ;;  %5142 = vmatpush3.bf16.msra.mxu1 %v5141_v18  ;;  %v3437_v17 = vld [vmem:[%s7050_s14 + $0x4c8] sm:$0xff]  ;;  %v3468_v18 = vld [vmem:[%s7050_s14 + $0x5c0] sm:$0xff]  ;;  %v3498_v55 = vld [vmem:[%s7050_s14 + $0x6b0] sm:$0xff] }
0x115d   : > { %5144 = vmatprep.subr.bf16.mxu0 %v5143_v16  ;;  %5176 = vmatprep.subr.bf16.mxu1 %v5175_v20  ;;  %v3469_v16 = vld [vmem:[%s7050_s14 + $0x5c8] sm:$0xff]  ;;  %v5159_v20 = vpack.c.bf16 %v3437_v17, %v3436_v15  ;;  %v2680_v15 = vrot.slane %v6321_v37, %v2647_v61  ;;  %v5173_v17 = vpack.c.bf16 %v3427_v4, %v3426_v2  ;;  %v3500_v2 = vld [vmem:[%s7050_s14 + $0x6c0] sm:$0xff] }
0x115e   : > { %v5191_v25 = vpack.c.bf16 %v3469_v16, %v3468_v18  ;;  %v5207_v16 = vpack.c.bf16 %v3493_v13, %v3492_v12  ;;  %v3509_v37 = vld [vmem:[%s7050_s14 + $0x708] sm:$0xff]  ;;  %v3195_v61 = vadd.f32 %v6532_v53, %v2672_v36  ;;  %v3527_v53 = vld [vmem:[%s7050_s14 + $0x798] sm:$0xff]  ;;  %v5219_v58 = vpack.c.bf16 %v3499_v3, %v3498_v55  ;;  %v3484_v36 = vld [vmem:[%s7050_s14 + $0x640] sm:$0xff] }
0x115f   : > { %3752 = vmatmul.mubr.f32.vlgmr.msra.gmra.mrb[32].mxu0 %v3272_v30  ;;  %3822 = vmatmul.mubr.f32.vlgmr.msra.gmra.mrb[36].mxu1 %v3274_v31  ;;  %v5163_v30 = vpack.c.bf16 %v3439_v26, %v3438_v22  ;;  %v3422_v31 = vld [vmem:[%s7050_s14 + $0x450] sm:$0xff]  ;;  %v3266_v43 = vadd.f32 %v6534_v54, %v2680_v15  ;;  %v5241_v22 = vpack.c.bf16 %v3509_v37, %v3508_v35  ;;  %v3479_v54 = vld [vmem:[%s7050_s14 + $0x618] sm:$0xff]  ;;  %v3501_v4 = vld [vmem:[%s7050_s14 + $0x6c8] sm:$0xff]  ;;  %v3280_v3 = vmax.f32 %v6527_v51, 0.0 }
0x1160   : > { %5146 = vmatpush3.bf16.msra.mxu0 %v5145_v29  ;;  %3891 = vmatprep.mubr.f32.mxu0 %v3277_v44  ;;  %v5193_v29 = vpack.c.bf16 %v3453_v21, %v3452_v24  ;;  %v3440_v44 = vld [vmem:[%s7050_s14 + $0x4e0] sm:$0xff]  ;;  %v3276_v21 = vmax.f32 %v6469_v8, 0.0  ;;  %v3478_v26 = vld [vmem:[%s7050_s14 + $0x610] sm:$0xff]  ;;  %v3511_v8 = vld [vmem:[%s7050_s14 + $0x718] sm:$0xff]  ;;  %v5223_v13 = vpack.c.bf16 %v3501_v4, %v3500_v2 }
0x1161   : > { %5178 = vmatpush3.bf16.msra.mxu1 %v5177_v11  ;;  %3961 = vmatprep.mubr.f32.mxu1 %v3279_v50  ;;  %v3423_v11 = vld [vmem:[%s7050_s14 + $0x458] sm:$0xff]  ;;  %v5213_v34 = vpack.c.bf16 %v3479_v54, %v3478_v26 }
0x1162   : > { %5148 = vmatprep.subr.bf16.mxu0 %v5147_v45  ;;  %5180 = vmatprep.subr.bf16.mxu1 %v5179_v46  ;;  %v3441_v45 = vld [vmem:[%s7050_s14 + $0x4e8] sm:$0xff]  ;;  %v3472_v46 = vld [vmem:[%s7050_s14 + $0x5e0] sm:$0xff]  ;;  %v5165_v48 = vpack.c.bf16 %v3423_v11, %v3422_v31  ;;  %v3281_v31 = vmax.f32 %v3195_v61, 0.0  ;;  %v3486_v61 = vld [vmem:[%s7050_s14 + $0x650] sm:$0xff] }
0x1163   : > { %v5167_v50 = vpack.c.bf16 %v3441_v45, %v3440_v44  ;;  %v5245_v44 = vpack.c.bf16 %v3511_v8, %v3510_v27  ;;  %v3520_v8 = vld [vmem:[%s7050_s14 + $0x760] sm:$0xff] }
0x1164   : > { %5150 = vmatpush3.bf16.msra.mxu0 %v5149_v39  ;;  %v3456_v39 = vld [vmem:[%s7050_s14 + $0x560] sm:$0xff] }
0x1165   : > { %5182 = vmatpush3.bf16.msra.mxu1 %v5181_v38  ;;  %5152 = vmatprep.subr.bf16.mxu0 %v5151_v56  ;;  %v5199_v38 = vpack.c.bf16 %v3473_v47, %v3472_v46  ;;  %v3457_v56 = vld [vmem:[%s7050_s14 + $0x568] sm:$0xff]  ;;  %v3480_v46 = vld [vmem:[%s7050_s14 + $0x620] sm:$0xff] }
0x1166   : > { %5184 = vmatprep.subr.bf16.mxu1 %v5183_v40  ;;  %v3475_v40 = vld [vmem:[%s7050_s14 + $0x5f8] sm:$0xff]  ;;  %v5201_v63 = vpack.c.bf16 %v3457_v56, %v3456_v39  ;;  %v3481_v47 = vld [vmem:[%s7050_s14 + $0x628] sm:$0xff]  ;;  %v3530_v39 = vld [vmem:[%s7050_s14 + $0x7b0] sm:$0xff] }
0x1167   : > { %v5217_v56 = vpack.c.bf16 %v3481_v47, %v3480_v46  ;;  %v3491_v46 = vld [vmem:[%s7050_s14 + $0x678] sm:$0xff] }
0x1168   : > { %5154 = vmatpush3.bf16.msra.mxu0 %v5153_v5  ;;  %v3458_v5 = vld [vmem:[%s7050_s14 + $0x570] sm:$0xff] }
0x1169   : > { %5186 = vmatpush3.bf16.msra.mxu1 %v5185_v6  ;;  %5156 = vmatprep.subr.bf16.mxu0 %v5155_v7  ;;  %v5203_v6 = vpack.c.bf16 %v3475_v40, %v3474_v59  ;;  %v3459_v7 = vld [vmem:[%s7050_s14 + $0x578] sm:$0xff]  ;;  %v3482_v59 = vld [vmem:[%s7050_s14 + $0x630] sm:$0xff] }
0x116a   : > { %5188 = vmatprep.subr.bf16.mxu1 %v5187_v41  ;;  %v3524_v41 = vld [vmem:[%s7050_s14 + $0x780] sm:$0xff]  ;;  %v5205_v18 = vpack.c.bf16 %v3459_v7, %v3458_v5  ;;  %v3483_v40 = vld [vmem:[%s7050_s14 + $0x638] sm:$0xff] }
0x116b   : > { %v3532_v5 = vld [vmem:[%s7050_s14 + $0x7c0] sm:$0xff]  ;;  %v5221_v7 = vpack.c.bf16 %v3483_v40, %v3482_v59 }
0x116c   : > { %5158 = vmatpush3.bf16.msra.mxu0 %v5157_v19  ;;  %v3477_v19 = vld [vmem:[%s7050_s14 + $0x608] sm:$0xff] }
0x116d   : > { %5190 = vmatpush3.bf16.msra.mxu1 %v5189_v42  ;;  %5160 = vmatprep.subr.bf16.mxu0 %v5159_v20  ;;  %v5239_v42 = vpack.c.bf16 %v3525_v14, %v3524_v41  ;;  %v3494_v20 = vld [vmem:[%s7050_s14 + $0x690] sm:$0xff]  ;;  %v5209_v24 = vpack.c.bf16 %v3477_v19, %v3476_v60  ;;  %v3485_v41 = vld [vmem:[%s7050_s14 + $0x648] sm:$0xff]  ;;  %v3516_v14 = vld [vmem:[%s7050_s14 + $0x740] sm:$0xff] }
0x116e   : > { %5192 = vmatprep.subr.bf16.mxu1 %v5191_v25  ;;  %v3526_v25 = vld [vmem:[%s7050_s14 + $0x790] sm:$0xff]  ;;  %v3535_v19 = vld [vmem:[%s7050_s14 + $0x7d8] sm:$0xff] }
0x116f   : > { %v5243_v11 = vpack.c.bf16 %v3527_v53, %v3526_v25  ;;  %v3534_v60 = vld [vmem:[%s7050_s14 + $0x7d0] sm:$0xff]  ;;  %v3504_v25 = vld [vmem:[%s7050_s14 + $0x6e0] sm:$0xff]  ;;  %v3505_v53 = vld [vmem:[%s7050_s14 + $0x6e8] sm:$0xff] }
0x1170   : > { %5162 = vmatpush3.bf16.msra.mxu0 %v5161_v28  ;;  %v5211_v28 = vpack.c.bf16 %v3495_v23, %v3494_v20  ;;  %v3487_v20 = vld [vmem:[%s7050_s14 + $0x658] sm:$0xff]  ;;  %v3518_v23 = vld [vmem:[%s7050_s14 + $0x750] sm:$0xff]  ;;  %v5231_v27 = vpack.c.bf16 %v3505_v53, %v3504_v25 }
0x1171   : > { %5194 = vmatpush3.bf16.msra.mxu1 %v5193_v29  ;;  %5164 = vmatprep.subr.bf16.mxu0 %v5163_v30  ;;  %v3496_v29 = vld [vmem:[%s7050_s14 + $0x6a0] sm:$0xff]  ;;  %v3497_v30 = vld [vmem:[%s7050_s14 + $0x6a8] sm:$0xff]  ;;  %v5229_v26 = vpack.c.bf16 %v3487_v20, %v3486_v61 }
0x1172   : > { %5196 = vmatprep.subr.bf16.mxu1 %v5195_v33  ;;  %v3283_v33 = vmax.f32 %v3266_v43, 0.0  ;;  %v5215_v45 = vpack.c.bf16 %v3497_v30, %v3496_v29  ;;  %v5259_v43 = vpack.c.bf16 %v3535_v19, %v3534_v60  ;;  %v3521_v30 = vld [vmem:[%s7050_s14 + $0x768] sm:$0xff] }
0x1174   : > { %5166 = vmatpush3.bf16.msra.mxu0 %v5165_v48  ;;  %v3512_v48 = vld [vmem:[%s7050_s14 + $0x720] sm:$0xff] }
0x1175   : > { %5198 = vmatpush3.bf16.msra.mxu1 %v5197_v49  ;;  %5168 = vmatprep.subr.bf16.mxu0 %v5167_v50  ;;  %v5247_v49 = vpack.c.bf16 %v3529_v32, %v3528_v9  ;;  %v3513_v50 = vld [vmem:[%s7050_s14 + $0x728] sm:$0xff]  ;;  %v3538_v9 = vld [vmem:[%s7050_s14 + $0x7f0] sm:$0xff]  ;;  %v3539_v32 = vld [vmem:[%s7050_s14 + $0x7f8] sm:$0xff] }
0x1176   : > { %5200 = vmatprep.subr.bf16.mxu1 %v5199_v38  ;;  %v3531_v38 = vld [vmem:[%s7050_s14 + $0x7b8] sm:$0xff]  ;;  %v5249_v57 = vpack.c.bf16 %v3513_v50, %v3512_v48  ;;  %v5267_v47 = vpack.c.bf16 %v3539_v32, %v3538_v9  ;;  %v3522_v48 = vld [vmem:[%s7050_s14 + $0x770] sm:$0xff] }
0x1178   : > { %5170 = vmatpush3.bf16.msra.mxu0 %v5169_v62  ;;  %v3514_v62 = vld [vmem:[%s7050_s14 + $0x730] sm:$0xff] }
0x1179   : > { %5202 = vmatpush3.bf16.msra.mxu1 %v5201_v63  ;;  %5172 = vmatprep.subr.bf16.mxu0 %v5171_v0  ;;  %v5251_v63 = vpack.c.bf16 %v3531_v38, %v3530_v39  ;;  %v3515_v0 = vld [vmem:[%s7050_s14 + $0x738] sm:$0xff]  ;;  %v3282_v39 = vmax.f32 %v6530_v52, 0.0 }
0x117a   : > { %5204 = vmatprep.subr.bf16.mxu1 %v5203_v6  ;;  %v3533_v6 = vld [vmem:[%s7050_s14 + $0x7c8] sm:$0xff]  ;;  %v5253_v12 = vpack.c.bf16 %v3515_v0, %v3514_v62 }
0x117b   : > { %v5255_v15 = vpack.c.bf16 %v3533_v6, %v3532_v5 }
0x117c   : > { %5174 = vmatpush3.bf16.msra.mxu0 %v5173_v17  ;;  %v3517_v17 = vld [vmem:[%s7050_s14 + $0x748] sm:$0xff] }
0x117d   : > { %5206 = vmatpush3.bf16.msra.mxu1 %v5205_v18  ;;  %5208 = vmatprep.subr.bf16.mxu0 %v5207_v16  ;;  %v3502_v18 = vld [vmem:[%s7050_s14 + $0x6d0] sm:$0xff]  ;;  %v3503_v16 = vld [vmem:[%s7050_s14 + $0x6d8] sm:$0xff]  ;;  %v5257_v35 = vpack.c.bf16 %v3517_v17, %v3516_v14 }
0x117e   : > { %5240 = vmatprep.subr.bf16.mxu1 %v5239_v42  ;;  %v5225_v42 = vpack.c.bf16 %v3485_v41, %v3484_v36  ;;  %v5227_v37 = vpack.c.bf16 %v3503_v16, %v3502_v18 }
0x117f   : > { %3892 = vmatmul.mubr.f32.vlgmr.msra.gmra.mrb[34].mxu0 %v3276_v21  ;;  %v3536_v21 = vld [vmem:[%s7050_s14 + $0x7e0] sm:$0xff] }
0x1180   : > { %3962 = vmatmul.mubr.f32.vlgmr.msra.gmra.mrb[38].mxu1 %v3278_v10  ;;  %5210 = vmatpush3.bf16.msra.mxu0 %v5209_v24  ;;  %v3519_v24 = vld [vmem:[%s7050_s14 + $0x758] sm:$0xff]  ;;  %v3488_v10 = vld [vmem:[%s7050_s14 + $0x660] sm:$0xff] }
0x1181   : > { %4031 = vmatprep.mubr.f32.mxu0 %v3281_v31  ;;  %5242 = vmatpush3.bf16.msra.mxu1 %v5241_v22  ;;  %v3537_v22 = vld [vmem:[%s7050_s14 + $0x7e8] sm:$0xff]  ;;  %v5261_v54 = vpack.c.bf16 %v3519_v24, %v3518_v23  ;;  %v3506_v31 = vld [vmem:[%s7050_s14 + $0x6f0] sm:$0xff] }
0x1182   : > { %4101 = vmatprep.mubr.f32.mxu1 %v3283_v33  ;;  %5212 = vmatprep.subr.bf16.mxu0 %v5211_v28  ;;  %v3489_v28 = vld [vmem:[%s7050_s14 + $0x668] sm:$0xff]  ;;  %v5263_v29 = vpack.c.bf16 %v3537_v22, %v3536_v21 }
0x1183   : > { %5244 = vmatprep.subr.bf16.mxu1 %v5243_v11  ;;  %v3507_v11 = vld [vmem:[%s7050_s14 + $0x6f8] sm:$0xff]  ;;  %v5233_v33 = vpack.c.bf16 %v3489_v28, %v3488_v10 }
0x1184   : > { %5214 = vmatpush3.bf16.msra.mxu0 %v5213_v34  ;;  %v5265_v34 = vpack.c.bf16 %v3521_v30, %v3520_v8 }
0x1185   : > { %5246 = vmatpush3.bf16.msra.mxu1 %v5245_v44  ;;  %5216 = vmatprep.subr.bf16.mxu0 %v5215_v45  ;;  %v5235_v44 = vpack.c.bf16 %v3507_v11, %v3506_v31  ;;  %v3490_v45 = vld [vmem:[%s7050_s14 + $0x670] sm:$0xff] }
0x1186   : > { %5248 = vmatprep.subr.bf16.mxu1 %v5247_v49  ;;  %v3523_v49 = vld [vmem:[%s7050_s14 + $0x778] sm:$0xff]  ;;  %v5237_v50 = vpack.c.bf16 %v3491_v46, %v3490_v45 }
0x1187   : > { %v5269_v55 = vpack.c.bf16 %v3523_v49, %v3522_v48 }
0x1188   : > { %5218 = vmatpush3.bf16.msra.mxu0 %v5217_v56 }
0x1189   : > { %5250 = vmatpush3.bf16.msra.mxu1 %v5249_v57  ;;  %5220 = vmatprep.subr.bf16.mxu0 %v5219_v58  ;;  %v4316_v57 = vld [vmem:[%s7051_s15] ss:$0 sm:$0xff] }
0x118a   : > { %5252 = vmatprep.subr.bf16.mxu1 %v5251_v63 }
0x118c   : > { %5222 = vmatpush3.bf16.msra.mxu0 %v5221_v7 }
0x118d   : > { %5254 = vmatpush3.bf16.msra.mxu1 %v5253_v12  ;;  %5224 = vmatprep.subr.bf16.mxu0 %v5223_v13 }
0x118e   : > { %5256 = vmatprep.subr.bf16.mxu1 %v5255_v15 }
0x1190   : > { %5226 = vmatpush3.bf16.msra.mxu0 %v5225_v42 }
0x1191   : > { %5258 = vmatpush3.bf16.msra.mxu1 %v5257_v35  ;;  %5228 = vmatprep.subr.bf16.mxu0 %v5227_v37 }
0x1192   : > { %5260 = vmatprep.subr.bf16.mxu1 %v5259_v43 }
0x1194   : > { %5230 = vmatpush3.bf16.msra.mxu0 %v5229_v26 }
0x1195   : > { %5262 = vmatpush3.bf16.msra.mxu1 %v5261_v54  ;;  %5232 = vmatprep.subr.bf16.mxu0 %v5231_v27 }
0x1196   : > { %5264 = vmatprep.subr.bf16.mxu1 %v5263_v29  ;;  %v4318_v29 = vld [vmem:[%s7053_s17] ss:$0 sm:$0xff] }
0x1198   : > { %5234 = vmatpush3.bf16.msra.mxu0 %v5233_v33 }
0x1199   : > { %5266 = vmatpush3.bf16.msra.mxu1 %v5265_v34  ;;  %5236 = vmatprep.subr.bf16.mxu0 %v5235_v44 }
0x119a   : > { %5268 = vmatprep.subr.bf16.mxu1 %v5267_v47 }
0x119c   : > { %5238 = vmatpush3.bf16.msra.mxu0 %v5237_v50 }
0x119d   : > { %5270 = vmatpush3.bf16.msra.mxu1 %v5269_v55 }
0x119f   : > { %4032 = vmatmul.mubr.f32.vlgmr.msra.gmra.mrb[36].mxu0 %v3280_v3 }
0x11a0   : > { %4102 = vmatmul.mubr.f32.vlgmr.msra.gmra.mrb[40].mxu1 %v3282_v39 }
0x1212   : > { %v4439_v38 = vpop.f32.mrb[30].mxu0  ;;  %v4474_v56 = vpop.f32.mrb[34].mxu1 }
0x1213   : > { %v4440_v58 = vpop.f32.mrb[31].mxu0  ;;  %v4475_v59 = vpop.f32.mrb[35].mxu1 }
0x1214   : > { %v4441_v40 = vadd.f32 %v4440_v58, %v4439_v38  ;;  %v4476_v62 = vadd.f32 %v4475_v59, %v4474_v56 }
0x1216   : > { %v3614_v63 = vadd.f32 %v4441_v40, %v4316_v57 }
0x1218   : > { %v3684_v0 = vadd.f32 %v4476_v62, %v3614_v63 }
0x1232   : > { %v4509_v2 = vpop.f32.mrb[32].mxu0  ;;  %v4544_v4 = vpop.f32.mrb[36].mxu1 }
0x1233   : > { %v4510_v51 = vpop.f32.mrb[33].mxu0  ;;  %v4545_v5 = vpop.f32.mrb[37].mxu1 }
0x1234   : > { %v4511_v6 = vadd.f32 %v4510_v51, %v4509_v2  ;;  %v4546_v52 = vadd.f32 %v4545_v5, %v4544_v4 }
0x1236   : > { %v3754_v7 = vadd.f32 %v4511_v6, %v3684_v0 }
0x1238   : > { %v3824_v12 = vadd.f32 %v4546_v52, %v3754_v7 }
0x1252   : > { %v4579_v13 = vpop.f32.mrb[34].mxu0 }
0x1253   : > { %v4614_v36 = vpop.f32.mrb[38].mxu1  ;;  %v4580_v41 = vpop.f32.mrb[35].mxu0 }
0x1254   : > { %v4581_v14 = vadd.f32 %v4580_v41, %v4579_v13  ;;  %v4615_v15 = vpop.f32.mrb[39].mxu1 }
0x1255   : > { %v4616_v17 = vadd.f32 %v4615_v15, %v4614_v36 }
0x1256   : > { %v3894_v18 = vadd.f32 %v4581_v14, %v3824_v12 }
0x1258   : > { %v3964_v16 = vadd.f32 %v4616_v17, %v3894_v18 }
0x1272   : > { %v4649_v60 = vpop.f32.mrb[36].mxu0 }
0x1273   : > { %v4684_v19 = vpop.f32.mrb[40].mxu1  ;;  %v4650_v42 = vpop.f32.mrb[37].mxu0 }
0x1274   : > { %v4651_v35 = vadd.f32 %v4650_v42, %v4649_v60  ;;  %v4685_v37 = vpop.f32.mrb[41].mxu1 }
0x1275   : > { %v4686_v61 = vadd.f32 %v4685_v37, %v4684_v19 }
0x1276   : > { %v4034_v20 = vadd.f32 %v4651_v35, %v3964_v16 }
0x1278   : > { %v4104_v23 = vadd.f32 %v4686_v61, %v4034_v20 }
0x127a   : > { %v4107_v43 = vadd.f32 %v4104_v23, %v5985_v1  ;;  %v4317_v1 = vld [vmem:[%s7052_s16] ss:$0 sm:$0xff] }
0x127c   : > { %v4110_v24 = vsel %vm585_vm1, %v4107_v43, 0.0 }
0x127d   : > { %4111 = vadd.xlane.f32.xlu0 %v4110_v24 }
0x130a   : > { %v4112_v25 = vpop.xlane.xlu0 %4111 }
0x130b   : > { %v4113_v53 = vmul.f32 0.03125, %v4112_v25 }
0x130d   : > { %v4114_v21 = vsub.f32 %v4107_v43, %v4113_v53 }
0x130f   : > { %v4115_v22 = vmul.f32 %v4114_v21, %v4114_v21 }
0x1311   : > { %v4116_v26 = vsel %vm585_vm1, %v4115_v22, 0.0 }
0x1312   : > { %4117 = vadd.xlane.f32.xlu1 %v4116_v26 }
0x139f   : > { %v4118_v54 = vpop.xlane.xlu1 %4117 }
0x13a0   : > { %v4119_v27 = vmul.f32 0.03125, %v4118_v54 }
0x13a2   : > { %v4120_v10 = vadd.f32 1e-05, %v4119_v27 }
0x13a4   : > { %5331 = vrsqrt.f32 %v4120_v10 }
0x13ae   : > { %v5332_v28 = vpop.eup %5331 }
0x13af   : > { %v4122_v8 = vmul.f32 %v5332_v28, %v4114_v21 }
0x13b1   : > { %v4129_v30 = vmul.f32 %v4317_v1, %v4122_v8 }
0x13b3   : > { %v4136_v31 = vadd.f32 %v4318_v29, %v4129_v30 }
0x13b5   : > { %4137 = vst.msk [vmem:[%s566_s24] sm:$0xff] %vm585_vm1, %v4136_v31 }
0x13b6   : > { %5346 = shalt.err (!%p5343_p3)
}
0x13b7   : > { %s5347_s21 = scalar_lea.hbm %s6993_s20, 128  ;;  %s5351_s24 = scalar_lea.hbm %s7054_s18, 256 }
0x13b8   : > { %p5348_p4 = scmp.ne.s32.totalorder %s6993_s20, %s5347_s21  ;;  %p5352_p9 = scmp.lt.u32.totalorder %s6993_s20, %s7054_s18 }
0x13b9   : > { %p5353_p10 = scmp.lt.u32.totalorder %s5351_s24, %s5347_s21  ;;  %p5355_p12 = scmp.lt.u32.totalorder %s5347_s21, %s6993_s20 }
0x13ba   : > { %p5349_p7 = pnand %p5348_p4, %p5534_p5 }
0x13bb   : > { %p5354_p11 = por %p5353_p10, %p5352_p9 }
0x13bc   : > { %p5350_p8 = pneg %p5349_p7 }
0x13bd   : > { %p5356_p13 = por %p5355_p12, %p5354_p11 }
0x13bf   : > { %p5357_p0 = pnand %p5356_p13, %p5350_p8 }
0x13c1   : > { %5360 = shalt.err (!%p5357_p0)
}
0x13c2   : > { %5271 = dma.vmem_to_hbm [thread:$0]  (%p5534_p5), %s6995_s25, 128, %s6993_s20, %s4139_s29  }
0x13c3 PF: > { %s7078_s1 = sld [smem:[#allocation5_spill]]  ;;  %p5277_p1 = scmp.ge.s32.totalorder %s5395_s30, 2 }
0x13c5   : > { %p5274_p2 = pnand %p5277_p1, %p5538_p6 }
0x13c9   : > { %s4164_s3 = sand.u32 1, %s7078_s1  }
0x13ca   : > { %s4165_s4 = scalar_lea.sflag [#allocation3], %s4164_s3 }
0x13cb   : > { %5378 = dma.done.wait (!%p5274_p2), %s4165_s4, 128  }
0x13cc   : > { %5380 = vsyncadd (!%p5274_p2), %s4165_s4, 4294967168  ;;  %s7080_s30 = sld [smem:[#allocation7_spill]]  ;;  %s7081_s21 = sld [smem:[#allocation6_spill]] }
0x13cd   : > { %s7082_s29 = sld [smem:[#allocation8_spill]]  ;;  %s7083_s27 = smov %s5387_s28 }
0x13d2   : > { %p28_p3 = scmp.ge.s32.totalorder %s7080_s30, 4   ;;  %s7084_s28 = smov %s7081_s21 }
0x13d4   :  { %30 = sbr.rel (!%p28_p3) target bundleno = 9 (0x9), region = 148 }
0x13db   :  { %4170 = vsyncpa [#allocation3], 1 }
0x13dc   :  { %4172 = vsyncpa [#allocation3 + $0x1], 1 }

</bundles_post_ra>
